<compile_context>
chip_gen: v7x
topology: tpu7x:2x2x1
jax: 0.10.0
libtpu: 0.0.40
codegen_flags: <defaults>
</compile_context>

<pallas_src>
import functools

import jax
import jax.numpy as jnp
from jax.experimental import pallas as pl
from jax.experimental.pallas import tpu as pltpu


def _round_up(x, m):
    return (x + m - 1) // m * m


def _pick_batch_tile(n):
    """Batch rows per grid step.

    Capped at 128 (safe under v7x's 64 MiB/TC VMEM once the f32 [TN, L_pad, F]
    conv intermediate is counted); aims for >= 4 grid steps so the x-tile DMA
    double-buffers against compute.  Sweep 256/512 on v5e/v6e if profiling
    shows VMEM headroom.
    """
    if n <= 8:
        return n                      # block dim == full batch dim
    return max(8, min(128, _round_up(pl.cdiv(n, 4), 8)))


def _vmem_limit_bytes():
    """~3/4 of physical VMEM, capped at 96 MiB (96 MiB v5e/v6e, 48 MiB v7x)."""
    try:
        cap = int(pltpu.get_tpu_info().vmem_capacity_bytes)
    except Exception:
        cap = 64 * 1024 * 1024
    return min(96 * 1024 * 1024, (cap * 3) // 4)


def _const_spec(shape, single_buffer):
    """BlockSpec for an operand that is identical at every grid step."""
    ndim = len(shape)
    index_map = lambda i: (0,) * ndim
    if single_buffer:
        # The block never changes, so the second pipeline buffer is pure VMEM
        # waste (matters most under v7x's 64 MiB/TC budget).
        return pl.BlockSpec(shape, index_map,
                            pipeline_mode=pl.Buffered(buffer_count=1))
    return pl.BlockSpec(shape, index_map)


def _kimcnn_kernel(W, L_pad, Kmax, x_ref, w_ref, bm_ref, wfc_ref, bfc_ref,
                   out_ref, xbuf_ref):
    """One batch tile.

    x_ref:    [TN, W, D]       input dtype (f32 here)  -- raw embeddings
    w_ref:    [Kmax, D, F]     bf16  packed conv weights (zero for k >= K_i)
    bm_ref:   [L_pad, F]       f32   conv bias where (t, f) valid, -1e30 else
    wfc_ref:  [F, C_pad]       bf16  FC weight (zero rows/cols in padding)
    bfc_ref:  [1, C_pad]       f32   FC bias (-1e30 in padded class lanes)
    out_ref:  [TN, C_pad]      f32   softmax probabilities (padded lanes -> 0)
    xbuf_ref: [TN, W_pad, D]   bf16  VMEM scratch: cast + time-padded x tile
    """
    TN, _, D = x_ref.shape
    W_pad = xbuf_ref.shape[1]
    F = w_ref.shape[2]

    # In-kernel bf16 cast + zero time-tail (replaces the wrapper pad/cast pass).
    xbuf_ref[:, :W, :] = x_ref[...].astype(jnp.bfloat16)
    if W_pad > W:
        # Zero every step (cheap: <= L_pad rounding + Kmax-1 rows) so the tail
        # is valid regardless of how the grid is sharded across TensorCores.
        xbuf_ref[:, W:, :] = jnp.zeros((TN, W_pad - W, D), jnp.bfloat16)

    # Per-tap sub-matmul accumulation (no lane-axis concat / im2col copy).
    def tap(k):
        xk = xbuf_ref[:, k:k + L_pad, :].reshape(TN * L_pad, D)   # bf16
        return jnp.dot(xk, w_ref[k], preferred_element_type=jnp.float32)

    acc = tap(0)
    for k in range(1, Kmax):          # static, Kmax is tiny (e.g. 5)
        acc = acc + tap(k)
    conv = acc.reshape(TN, L_pad, F)                              # [TN, L_pad, F] f32

    # Fused bias + ReLU + validity mask: invalid (t, f) have bias -1e30 so the
    # ReLU clamps them to exactly 0 -> max-pool stays exact.  2 VALU ops/elem.
    act = jnp.maximum(conv + bm_ref[...], 0.0)
    h = jnp.max(act, axis=1)                                      # [TN, F]

    # TODO(synk): nn.Dropout is identity in eval mode; no dropout mask applied.
    logits = jnp.dot(h.astype(wfc_ref.dtype), wfc_ref[...],
                     preferred_element_type=jnp.float32) + bfc_ref[...]

    m = jnp.max(logits, axis=1, keepdims=True)
    e = jnp.exp(logits - m)                                       # padded classes -> 0
    inv = pl.reciprocal(jnp.sum(e, axis=1, keepdims=True), approx=True)
    out_ref[...] = (e * inv).astype(out_ref.dtype)


def preprocess_params(conv_weights, conv_biases, fc_weight, fc_bias,
                      kernel_sizes, seq_len):
    """One-time weight packing (hoisted out of the per-call path).

    conv_weights[i]: [Co, 1, K_i, D] (PyTorch Conv2d layout)
    fc_weight:       [C, len(Ks)*Co] (PyTorch Linear layout)
    """
    Ks = tuple(int(k) for k in kernel_sizes)
    n_ks = len(Ks)
    Co = int(conv_weights[0].shape[0])
    D = int(conv_weights[0].shape[3])
    C = int(fc_weight.shape[0])
    W = int(seq_len)
    Kmin, Kmax = min(Ks), max(Ks)
    assert W >= Kmax, (
        f"seq_len={W} shorter than largest kernel size {Kmax}; "
        f"PyTorch Conv2d would error on this input.")

    # L_pad multiple of 16 -> the (TN, L_pad, D) <-> (TN*L_pad, D) reshapes of
    # the k=0 tap are bf16 sublane-tile aligned (k>=1 taps pay one repack each).
    L_pad = _round_up(W - Kmin + 1, 16)
    W_pad = L_pad + Kmax - 1
    Ctot = n_ks * Co
    F = _round_up(Ctot, 128)        # lane-dense conv-feature axis (don't over-pad)
    C_pad = _round_up(C, 128)       # lane-dense class axis
    NEG = jnp.float32(-1e30)

    # w_pack[k, d, idx*Co + co] = conv_weights[idx][co, 0, k, d]  (0 for k >= K_idx)
    w_pack = jnp.zeros((Kmax, D, F), jnp.float32)
    # bias_mask[t, f]: conv bias where position t is valid for that kernel size,
    # -1e30 where invalid or in padded feature lanes (ReLU -> exact 0 there).
    bias_mask = jnp.full((L_pad, F), NEG, jnp.float32)
    for idx, K in enumerate(Ks):
        w = jnp.transpose(conv_weights[idx][:, 0], (1, 2, 0))       # [K, D, Co]
        w_pack = w_pack.at[:K, :, idx * Co:(idx + 1) * Co].set(w)
        valid = W - K + 1
        bias_mask = bias_mask.at[:valid, idx * Co:(idx + 1) * Co].set(
            conv_biases[idx])

    fc_w = jnp.zeros((F, C_pad), jnp.float32).at[:Ctot, :C].set(fc_weight.T)
    # Padded class lanes get -1e30 bias -> exp() underflows to exactly 0.
    fc_b = jnp.full((1, C_pad), NEG, jnp.float32).at[0, :C].set(fc_bias)

    return {
        "w_pack": w_pack.astype(jnp.bfloat16),   # bf16 MXU operands, f32 accumulation
        "fc_w": fc_w.astype(jnp.bfloat16),
        "bias_mask": bias_mask,
        "fc_b": fc_b,
        "dims": {"W": W, "W_pad": W_pad, "L_pad": L_pad, "Kmax": Kmax,
                 "D": D, "C": C, "F": F, "C_pad": C_pad},
    }


def kimcnn_forward(x, params):
    """x: [N, W, D] float32/bfloat16. Returns softmax probabilities [N, C]."""
    d = params["dims"]
    W, W_pad, L_pad, Kmax = d["W"], d["W_pad"], d["L_pad"], d["Kmax"]
    D, F, C_pad, C = d["D"], d["F"], d["C_pad"], d["C"]
    N = x.shape[0]
    assert x.shape == (N, W, D)

    TN = _pick_batch_tile(N)
    G = pl.cdiv(N, TN)
    N_pad = G * TN
    # x is fed to the kernel as-is (no whole-array pad/cast pre-pass); only the
    # batch axis is padded, and only when N does not divide the tile.
    x_in = jnp.pad(x, ((0, N_pad - N), (0, 0), (0, 0))) if N_pad != N else x

    kernel = functools.partial(_kimcnn_kernel, W, L_pad, Kmax)
    x_spec = pl.BlockSpec((TN, W, D), lambda i: (i, 0, 0))
    out_spec = pl.BlockSpec((TN, C_pad), lambda i: (i, 0))

    def build(single_buffer_weights):
        return pl.pallas_call(
            kernel,
            out_shape=jax.ShapeDtypeStruct((N_pad, C_pad), jnp.float32),
            grid=(G,),
            in_specs=[
                x_spec,  # streams per grid step (double-buffered HBM->VMEM DMA)
                _const_spec((Kmax, D, F), single_buffer_weights),
                _const_spec((L_pad, F), single_buffer_weights),
                _const_spec((F, C_pad), single_buffer_weights),
                _const_spec((1, C_pad), single_buffer_weights),
            ],
            out_specs=out_spec,
            scratch_shapes=[pltpu.VMEM((TN, W_pad, D), jnp.bfloat16)],
            compiler_params=pltpu.CompilerParams(
                # Batch axis is embarrassingly parallel.
                # TODO(synk): on v7x verify both TCs are busy; else CORE_PARALLEL.
                dimension_semantics=("parallel",),
                vmem_limit_bytes=_vmem_limit_bytes(),
            ),
        )

    args = (x_in, params["w_pack"], params["bias_mask"],
            params["fc_w"], params["fc_b"])
    try:
        out = jax.block_until_ready(build(True)(*args))
    except Exception:
        # pipeline_mode=pl.Buffered(1) not supported by this JAX build; fall
        # back to default double-buffered constant operands.
        out = jax.block_until_ready(build(False)(*args))
    return out[:N, :C]


def _reference(x, conv_weights, conv_biases, fc_weight, fc_bias, kernel_sizes):
    """Pure-JAX f32 reference mirroring the PyTorch forward (static=True, eval)."""
    feats = []
    for w, b, K in zip(conv_weights, conv_biases, kernel_sizes):
        L = x.shape[1] - K + 1
        cols = []
        for t in range(L):
            patch = x[:, t:t + K, :]                              # [N, K, D]
            cols.append(jnp.einsum('nkd,ckd->nc', patch, w[:, 0]) + b)
        conv = jnp.stack(cols, axis=2)                            # [N, Co, L]
        conv = jnp.maximum(conv, 0.0)
        feats.append(jnp.max(conv, axis=2))                       # [N, Co]
    h = jnp.concatenate(feats, axis=1)
    logits = h @ fc_weight.T + fc_bias
    return jax.nn.softmax(logits, axis=1)


if __name__ == "__main__":
    # Small shapes consistent with the module's forward (static=True branch).
    N, W, D = 2, 16, 32          # batch, seq len, embed dim
    Co, C = 8, 4                 # kernel_num, class_num
    Ks = (3, 4, 5)               # kernel_sizes

    key = jax.random.PRNGKey(0)
    keys = jax.random.split(key, 1 + 2 * len(Ks) + 2)

    x = jax.random.normal(keys[0], (N, W, D), dtype=jnp.float32)
    conv_weights, conv_biases = [], []
    for i, K in enumerate(Ks):
        conv_weights.append(
            0.1 * jax.random.normal(keys[1 + 2 * i], (Co, 1, K, D), dtype=jnp.float32))
        conv_biases.append(
            0.1 * jax.random.normal(keys[2 + 2 * i], (Co,), dtype=jnp.float32))
    fc_weight = 0.1 * jax.random.normal(keys[1 + 2 * len(Ks)], (C, len(Ks) * Co),
                                        dtype=jnp.float32)
    fc_bias = 0.1 * jax.random.normal(keys[2 + 2 * len(Ks)], (C,), dtype=jnp.float32)

    params = preprocess_params(conv_weights, conv_biases, fc_weight, fc_bias, Ks, W)
    out = kimcnn_forward(x, params)
    out = jax.block_until_ready(out)

    ref = _reference(x, conv_weights, conv_biases, fc_weight, fc_bias, Ks)
    assert out.shape == (N, C)
    # bf16 matmul operands (f32 accumulation) + approx-reciprocal softmax denom.
    assert jnp.allclose(out, ref, atol=2e-2, rtol=2e-2), (out, ref)

    print("KERNEL_OK")
</pallas_src>

<mosaic_0001>
module attributes {stable_mosaic.version = 11 : i64} {
  func.func @_kimcnn_kernel(%arg0: i32, %arg1: memref<2x16x32xf32, #tpu.memory_space<vmem>>, %arg2: memref<5x32x128xbf16, #tpu.memory_space<vmem>>, %arg3: memref<16x128xf32, #tpu.memory_space<vmem>>, %arg4: memref<128x128xbf16, #tpu.memory_space<vmem>>, %arg5: memref<1x128xf32, #tpu.memory_space<vmem>>, %arg6: memref<2x128xf32, #tpu.memory_space<vmem>>, %arg7: memref<2x20x32xbf16, #tpu.memory_space<vmem>>) attributes {dimension_semantics = [#tpu.dimension_semantics<parallel>], iteration_bounds = array<i64: 1>, scalar_prefetch = 0 : i64, scratch_operands = 1 : i64, tpu.core_type = #tpu.core_type<tc>, window_params = [{transform_indices = @transform_0, window_bounds = array<i64: 2, 16, 32>}, {pipeline_mode = #tpu.pipeline_mode<synchronous>, transform_indices = @transform_1, window_bounds = array<i64: 5, 32, 128>}, {pipeline_mode = #tpu.pipeline_mode<synchronous>, transform_indices = @transform_2, window_bounds = array<i64: 16, 128>}, {pipeline_mode = #tpu.pipeline_mode<synchronous>, transform_indices = @transform_3, window_bounds = array<i64: 128, 128>}, {pipeline_mode = #tpu.pipeline_mode<synchronous>, transform_indices = @transform_4, window_bounds = array<i64: 1, 128>}, {transform_indices = @transform_5, window_bounds = array<i64: 2, 128>}]} {
    %c0 = arith.constant 0 : index
    %c0_0 = arith.constant 0 : index
    %c0_1 = arith.constant 0 : index
    %0 = vector.load %arg1[%c0, %c0_0, %c0_1] : memref<2x16x32xf32, #tpu.memory_space<vmem>>, vector<2x16x32xf32>
    %1 = arith.truncf %0 : vector<2x16x32xf32> to vector<2x16x32xbf16>
    %c0_2 = arith.constant 0 : index
    %c0_3 = arith.constant 0 : index
    %c0_4 = arith.constant 0 : index
    %2 = vector.load %arg7[%c0_2, %c0_3, %c0_4] : memref<2x20x32xbf16, #tpu.memory_space<vmem>>, vector<2x16x32xbf16>
    tpu.vector_store %arg7[%c0_2, %c0_3, %c0_4], %1 {strides = array<i32>} : memref<2x20x32xbf16, #tpu.memory_space<vmem>>, vector<2x16x32xbf16>,
    %cst = arith.constant 0.000000e+00 : bf16
    %3 = vector.broadcast %cst : bf16 to vector<2x4x32xbf16>
    %c0_5 = arith.constant 0 : index
    %c16 = arith.constant 16 : index
    %c0_6 = arith.constant 0 : index
    %4 = vector.load %arg7[%c0_5, %c16, %c0_6] : memref<2x20x32xbf16, #tpu.memory_space<vmem>>, vector<2x4x32xbf16>
    tpu.vector_store %arg7[%c0_5, %c16, %c0_6], %3 {strides = array<i32>} : memref<2x20x32xbf16, #tpu.memory_space<vmem>>, vector<2x4x32xbf16>,
    %c0_7 = arith.constant 0 : index
    %c0_8 = arith.constant 0 : index
    %c0_9 = arith.constant 0 : index
    %5 = vector.load %arg7[%c0_7, %c0_8, %c0_9] : memref<2x20x32xbf16, #tpu.memory_space<vmem>>, vector<2x16x32xbf16>
    %6 = vector.shape_cast %5 : vector<2x16x32xbf16> to vector<32x32xbf16>
    %c0_10 = arith.constant 0 : index
    %c0_11 = arith.constant 0 : index
    %c0_12 = arith.constant 0 : index
    %7 = vector.load %arg2[%c0_10, %c0_11, %c0_12] : memref<5x32x128xbf16, #tpu.memory_space<vmem>>, vector<1x32x128xbf16>
    %8 = vector.shape_cast %7 : vector<1x32x128xbf16> to vector<32x128xbf16>
    %cst_13 = arith.constant dense<0.000000e+00> : vector<32x128xf32>
    %9 = tpu.matmul %6, %8, %cst_13 {dimension_numbers = #tpu.dot_dimension_numbers<[1], [0], [0], [1], [0, 0, 1, 1], [], []>} : vector<32x32xbf16>, vector<32x128xbf16>, vector<32x128xf32> -> vector<32x128xf32>
    %c0_14 = arith.constant 0 : index
    %c1 = arith.constant 1 : index
    %c0_15 = arith.constant 0 : index
    %10 = vector.load %arg7[%c0_14, %c1, %c0_15] : memref<2x20x32xbf16, #tpu.memory_space<vmem>>, vector<2x16x32xbf16>
    %11 = vector.shape_cast %10 : vector<2x16x32xbf16> to vector<32x32xbf16>
    %c1_16 = arith.constant 1 : index
    %c0_17 = arith.constant 0 : index
    %c0_18 = arith.constant 0 : index
    %12 = vector.load %arg2[%c1_16, %c0_17, %c0_18] : memref<5x32x128xbf16, #tpu.memory_space<vmem>>, vector<1x32x128xbf16>
    %13 = vector.shape_cast %12 : vector<1x32x128xbf16> to vector<32x128xbf16>
    %cst_19 = arith.constant dense<0.000000e+00> : vector<32x128xf32>
    %14 = tpu.matmul %11, %13, %cst_19 {dimension_numbers = #tpu.dot_dimension_numbers<[1], [0], [0], [1], [0, 0, 1, 1], [], []>} : vector<32x32xbf16>, vector<32x128xbf16>, vector<32x128xf32> -> vector<32x128xf32>
    %15 = arith.addf %9, %14 : vector<32x128xf32>
    %c0_20 = arith.constant 0 : index
    %c2 = arith.constant 2 : index
    %c0_21 = arith.constant 0 : index
    %16 = vector.load %arg7[%c0_20, %c2, %c0_21] : memref<2x20x32xbf16, #tpu.memory_space<vmem>>, vector<2x16x32xbf16>
    %17 = vector.shape_cast %16 : vector<2x16x32xbf16> to vector<32x32xbf16>
    %c2_22 = arith.constant 2 : index
    %c0_23 = arith.constant 0 : index
    %c0_24 = arith.constant 0 : index
    %18 = vector.load %arg2[%c2_22, %c0_23, %c0_24] : memref<5x32x128xbf16, #tpu.memory_space<vmem>>, vector<1x32x128xbf16>
    %19 = vector.shape_cast %18 : vector<1x32x128xbf16> to vector<32x128xbf16>
    %cst_25 = arith.constant dense<0.000000e+00> : vector<32x128xf32>
    %20 = tpu.matmul %17, %19, %cst_25 {dimension_numbers = #tpu.dot_dimension_numbers<[1], [0], [0], [1], [0, 0, 1, 1], [], []>} : vector<32x32xbf16>, vector<32x128xbf16>, vector<32x128xf32> -> vector<32x128xf32>
    %21 = arith.addf %15, %20 : vector<32x128xf32>
    %c0_26 = arith.constant 0 : index
    %c3 = arith.constant 3 : index
    %c0_27 = arith.constant 0 : index
    %22 = vector.load %arg7[%c0_26, %c3, %c0_27] : memref<2x20x32xbf16, #tpu.memory_space<vmem>>, vector<2x16x32xbf16>
    %23 = vector.shape_cast %22 : vector<2x16x32xbf16> to vector<32x32xbf16>
    %c3_28 = arith.constant 3 : index
    %c0_29 = arith.constant 0 : index
    %c0_30 = arith.constant 0 : index
    %24 = vector.load %arg2[%c3_28, %c0_29, %c0_30] : memref<5x32x128xbf16, #tpu.memory_space<vmem>>, vector<1x32x128xbf16>
    %25 = vector.shape_cast %24 : vector<1x32x128xbf16> to vector<32x128xbf16>
    %cst_31 = arith.constant dense<0.000000e+00> : vector<32x128xf32>
    %26 = tpu.matmul %23, %25, %cst_31 {dimension_numbers = #tpu.dot_dimension_numbers<[1], [0], [0], [1], [0, 0, 1, 1], [], []>} : vector<32x32xbf16>, vector<32x128xbf16>, vector<32x128xf32> -> vector<32x128xf32>
    %27 = arith.addf %21, %26 : vector<32x128xf32>
    %c0_32 = arith.constant 0 : index
    %c4 = arith.constant 4 : index
    %c0_33 = arith.constant 0 : index
    %28 = vector.load %arg7[%c0_32, %c4, %c0_33] : memref<2x20x32xbf16, #tpu.memory_space<vmem>>, vector<2x16x32xbf16>
    %29 = vector.shape_cast %28 : vector<2x16x32xbf16> to vector<32x32xbf16>
    %c4_34 = arith.constant 4 : index
    %c0_35 = arith.constant 0 : index
    %c0_36 = arith.constant 0 : index
    %30 = vector.load %arg2[%c4_34, %c0_35, %c0_36] : memref<5x32x128xbf16, #tpu.memory_space<vmem>>, vector<1x32x128xbf16>
    %31 = vector.shape_cast %30 : vector<1x32x128xbf16> to vector<32x128xbf16>
    %cst_37 = arith.constant dense<0.000000e+00> : vector<32x128xf32>
    %32 = tpu.matmul %29, %31, %cst_37 {dimension_numbers = #tpu.dot_dimension_numbers<[1], [0], [0], [1], [0, 0, 1, 1], [], []>} : vector<32x32xbf16>, vector<32x128xbf16>, vector<32x128xf32> -> vector<32x128xf32>
    %33 = arith.addf %27, %32 : vector<32x128xf32>
    %34 = vector.shape_cast %33 : vector<32x128xf32> to vector<2x16x128xf32>
    %c0_38 = arith.constant 0 : index
    %c0_39 = arith.constant 0 : index
    %35 = vector.load %arg3[%c0_38, %c0_39] : memref<16x128xf32, #tpu.memory_space<vmem>>, vector<16x128xf32>
    %36 = vector.shape_cast %35 : vector<16x128xf32> to vector<1x16x128xf32>
    %37 = vector.broadcast %36 : vector<1x16x128xf32> to vector<2x16x128xf32>
    %38 = arith.addf %34, %37 : vector<2x16x128xf32>
    %cst_40 = arith.constant 0.000000e+00 : f32
    %39 = vector.broadcast %cst_40 : f32 to vector<2x16x128xf32>
    %40 = arith.maximumf %38, %39 : vector<2x16x128xf32>
    %cst_41 = arith.constant dense<0xFF800000> : vector<2x128xf32>
    %41 = vector.multi_reduction <maximumf>, %40, %cst_41 [1] : vector<2x16x128xf32> to vector<2x128xf32>
    %42 = arith.truncf %41 : vector<2x128xf32> to vector<2x128xbf16>
    %c0_42 = arith.constant 0 : index
    %c0_43 = arith.constant 0 : index
    %43 = vector.load %arg4[%c0_42, %c0_43] : memref<128x128xbf16, #tpu.memory_space<vmem>>, vector<128x128xbf16>
    %cst_44 = arith.constant dense<0.000000e+00> : vector<2x128xf32>
    %44 = tpu.matmul %42, %43, %cst_44 {dimension_numbers = #tpu.dot_dimension_numbers<[1], [0], [0], [1], [0, 0, 1, 1], [], []>} : vector<2x128xbf16>, vector<128x128xbf16>, vector<2x128xf32> -> vector<2x128xf32>
    %c0_45 = arith.constant 0 : index
    %c0_46 = arith.constant 0 : index
    %45 = vector.load %arg5[%c0_45, %c0_46] : memref<1x128xf32, #tpu.memory_space<vmem>>, vector<1x128xf32>
    %46 = vector.broadcast %45 : vector<1x128xf32> to vector<2x128xf32>
    %47 = arith.addf %44, %46 : vector<2x128xf32>
    %cst_47 = arith.constant dense<0xFF800000> : vector<2xf32>
    %48 = vector.multi_reduction <maximumf>, %47, %cst_47 [1] : vector<2x128xf32> to vector<2xf32>
    %49 = vector.shape_cast %48 : vector<2xf32> to vector<2x1xf32>
    %50 = vector.broadcast %49 : vector<2x1xf32> to vector<2x128xf32>
    %51 = arith.subf %47, %50 : vector<2x128xf32>
    %52 = math.exp %51 : vector<2x128xf32>
    %cst_48 = arith.constant dense<0.000000e+00> : vector<2xf32>
    %53 = vector.multi_reduction <add>, %52, %cst_48 [1] : vector<2x128xf32> to vector<2xf32>
    %54 = vector.shape_cast %53 : vector<2xf32> to vector<2x1xf32>
    %55 = tpu.reciprocal %54 {approx = true} : vector<2x1xf32> -> vector<2x1xf32>
    %56 = vector.broadcast %55 : vector<2x1xf32> to vector<2x128xf32>
    %57 = arith.mulf %52, %56 : vector<2x128xf32>
    %c0_49 = arith.constant 0 : index
    %c0_50 = arith.constant 0 : index
    %58 = vector.load %arg6[%c0_49, %c0_50] : memref<2x128xf32, #tpu.memory_space<vmem>>, vector<2x128xf32>
    tpu.vector_store %arg6[%c0_49, %c0_50], %57 {strides = array<i32>} : memref<2x128xf32, #tpu.memory_space<vmem>>, vector<2x128xf32>,
    return
  }
  func.func @transform_0(%arg0: i32) -> (i32, i32, i32) {
    %c0_i32 = arith.constant 0 : i32
    %c0_i32_0 = arith.constant 0 : i32
    %c0_i32_1 = arith.constant 0 : i32
    return %arg0, %c0_i32, %c0_i32_0 : i32, i32, i32
  }
  func.func @transform_1(%arg0: i32) -> (i32, i32, i32) {
    %c0_i32 = arith.constant 0 : i32
    %c0_i32_0 = arith.constant 0 : i32
    %c0_i32_1 = arith.constant 0 : i32
    %c0_i32_2 = arith.constant 0 : i32
    return %c0_i32, %c0_i32_0, %c0_i32_1 : i32, i32, i32
  }
  func.func @transform_2(%arg0: i32) -> (i32, i32) {
    %c0_i32 = arith.constant 0 : i32
    %c0_i32_0 = arith.constant 0 : i32
    %c0_i32_1 = arith.constant 0 : i32
    return %c0_i32, %c0_i32_0 : i32, i32
  }
  func.func @transform_3(%arg0: i32) -> (i32, i32) {
    %c0_i32 = arith.constant 0 : i32
    %c0_i32_0 = arith.constant 0 : i32
    %c0_i32_1 = arith.constant 0 : i32
    return %c0_i32, %c0_i32_0 : i32, i32
  }
  func.func @transform_4(%arg0: i32) -> (i32, i32) {
    %c0_i32 = arith.constant 0 : i32
    %c0_i32_0 = arith.constant 0 : i32
    %c0_i32_1 = arith.constant 0 : i32
    return %c0_i32, %c0_i32_0 : i32, i32
  }
  func.func @transform_5(%arg0: i32) -> (i32, i32) {
    %c0_i32 = arith.constant 0 : i32
    %c0_i32_0 = arith.constant 0 : i32
    return %arg0, %c0_i32 : i32, i32
  }
}

module attributes {stable_mosaic.version = 11 : i64} {
  func.func @_kimcnn_kernel(%arg0: i32, %arg1: memref<2x16x32xf32, #tpu.memory_space<vmem>>, %arg2: memref<5x32x128xbf16, #tpu.memory_space<vmem>>, %arg3: memref<16x128xf32, #tpu.memory_space<vmem>>, %arg4: memref<128x128xbf16, #tpu.memory_space<vmem>>, %arg5: memref<1x128xf32, #tpu.memory_space<vmem>>, %arg6: memref<2x128xf32, #tpu.memory_space<vmem>>, %arg7: memref<2x20x32xbf16, #tpu.memory_space<vmem>>) attributes {dimension_semantics = [#tpu.dimension_semantics<parallel>], iteration_bounds = array<i64: 1>, scalar_prefetch = 0 : i64, scratch_operands = 1 : i64, tpu.core_type = #tpu.core_type<tc>, window_params = [{transform_indices = @transform_0, window_bounds = array<i64: 2, 16, 32>}, {pipeline_mode = #tpu.pipeline_mode<synchronous>, transform_indices = @transform_1, window_bounds = array<i64: 5, 32, 128>}, {pipeline_mode = #tpu.pipeline_mode<synchronous>, transform_indices = @transform_2, window_bounds = array<i64: 16, 128>}, {pipeline_mode = #tpu.pipeline_mode<synchronous>, transform_indices = @transform_3, window_bounds = array<i64: 128, 128>}, {pipeline_mode = #tpu.pipeline_mode<synchronous>, transform_indices = @transform_4, window_bounds = array<i64: 1, 128>}, {transform_indices = @transform_5, window_bounds = array<i64: 2, 128>}]} {
    %c0 = arith.constant 0 : index
    %c0_0 = arith.constant 0 : index
    %c0_1 = arith.constant 0 : index
    %0 = vector.load %arg1[%c0, %c0_0, %c0_1] : memref<2x16x32xf32, #tpu.memory_space<vmem>>, vector<2x16x32xf32>
    %1 = arith.truncf %0 : vector<2x16x32xf32> to vector<2x16x32xbf16>
    %c0_2 = arith.constant 0 : index
    %c0_3 = arith.constant 0 : index
    %c0_4 = arith.constant 0 : index
    %2 = vector.load %arg7[%c0_2, %c0_3, %c0_4] : memref<2x20x32xbf16, #tpu.memory_space<vmem>>, vector<2x16x32xbf16>
    tpu.vector_store %arg7[%c0_2, %c0_3, %c0_4], %1 {strides = array<i32>} : memref<2x20x32xbf16, #tpu.memory_space<vmem>>, vector<2x16x32xbf16>,
    %cst = arith.constant 0.000000e+00 : bf16
    %3 = vector.broadcast %cst : bf16 to vector<2x4x32xbf16>
    %c0_5 = arith.constant 0 : index
    %c16 = arith.constant 16 : index
    %c0_6 = arith.constant 0 : index
    %4 = vector.load %arg7[%c0_5, %c16, %c0_6] : memref<2x20x32xbf16, #tpu.memory_space<vmem>>, vector<2x4x32xbf16>
    tpu.vector_store %arg7[%c0_5, %c16, %c0_6], %3 {strides = array<i32>} : memref<2x20x32xbf16, #tpu.memory_space<vmem>>, vector<2x4x32xbf16>,
    %c0_7 = arith.constant 0 : index
    %c0_8 = arith.constant 0 : index
    %c0_9 = arith.constant 0 : index
    %5 = vector.load %arg7[%c0_7, %c0_8, %c0_9] : memref<2x20x32xbf16, #tpu.memory_space<vmem>>, vector<2x16x32xbf16>
    %6 = vector.shape_cast %5 : vector<2x16x32xbf16> to vector<32x32xbf16>
    %c0_10 = arith.constant 0 : index
    %c0_11 = arith.constant 0 : index
    %c0_12 = arith.constant 0 : index
    %7 = vector.load %arg2[%c0_10, %c0_11, %c0_12] : memref<5x32x128xbf16, #tpu.memory_space<vmem>>, vector<1x32x128xbf16>
    %8 = vector.shape_cast %7 : vector<1x32x128xbf16> to vector<32x128xbf16>
    %cst_13 = arith.constant dense<0.000000e+00> : vector<32x128xf32>
    %9 = tpu.matmul %6, %8, %cst_13 {dimension_numbers = #tpu.dot_dimension_numbers<[1], [0], [0], [1], [0, 0, 1, 1], [], []>} : vector<32x32xbf16>, vector<32x128xbf16>, vector<32x128xf32> -> vector<32x128xf32>
    %c0_14 = arith.constant 0 : index
    %c1 = arith.constant 1 : index
    %c0_15 = arith.constant 0 : index
    %10 = vector.load %arg7[%c0_14, %c1, %c0_15] : memref<2x20x32xbf16, #tpu.memory_space<vmem>>, vector<2x16x32xbf16>
    %11 = vector.shape_cast %10 : vector<2x16x32xbf16> to vector<32x32xbf16>
    %c1_16 = arith.constant 1 : index
    %c0_17 = arith.constant 0 : index
    %c0_18 = arith.constant 0 : index
    %12 = vector.load %arg2[%c1_16, %c0_17, %c0_18] : memref<5x32x128xbf16, #tpu.memory_space<vmem>>, vector<1x32x128xbf16>
    %13 = vector.shape_cast %12 : vector<1x32x128xbf16> to vector<32x128xbf16>
    %cst_19 = arith.constant dense<0.000000e+00> : vector<32x128xf32>
    %14 = tpu.matmul %11, %13, %cst_19 {dimension_numbers = #tpu.dot_dimension_numbers<[1], [0], [0], [1], [0, 0, 1, 1], [], []>} : vector<32x32xbf16>, vector<32x128xbf16>, vector<32x128xf32> -> vector<32x128xf32>
    %15 = arith.addf %9, %14 : vector<32x128xf32>
    %c0_20 = arith.constant 0 : index
    %c2 = arith.constant 2 : index
    %c0_21 = arith.constant 0 : index
    %16 = vector.load %arg7[%c0_20, %c2, %c0_21] : memref<2x20x32xbf16, #tpu.memory_space<vmem>>, vector<2x16x32xbf16>
    %17 = vector.shape_cast %16 : vector<2x16x32xbf16> to vector<32x32xbf16>
    %c2_22 = arith.constant 2 : index
    %c0_23 = arith.constant 0 : index
    %c0_24 = arith.constant 0 : index
    %18 = vector.load %arg2[%c2_22, %c0_23, %c0_24] : memref<5x32x128xbf16, #tpu.memory_space<vmem>>, vector<1x32x128xbf16>
    %19 = vector.shape_cast %18 : vector<1x32x128xbf16> to vector<32x128xbf16>
    %cst_25 = arith.constant dense<0.000000e+00> : vector<32x128xf32>
    %20 = tpu.matmul %17, %19, %cst_25 {dimension_numbers = #tpu.dot_dimension_numbers<[1], [0], [0], [1], [0, 0, 1, 1], [], []>} : vector<32x32xbf16>, vector<32x128xbf16>, vector<32x128xf32> -> vector<32x128xf32>
    %21 = arith.addf %15, %20 : vector<32x128xf32>
    %c0_26 = arith.constant 0 : index
    %c3 = arith.constant 3 : index
    %c0_27 = arith.constant 0 : index
    %22 = vector.load %arg7[%c0_26, %c3, %c0_27] : memref<2x20x32xbf16, #tpu.memory_space<vmem>>, vector<2x16x32xbf16>
    %23 = vector.shape_cast %22 : vector<2x16x32xbf16> to vector<32x32xbf16>
    %c3_28 = arith.constant 3 : index
    %c0_29 = arith.constant 0 : index
    %c0_30 = arith.constant 0 : index
    %24 = vector.load %arg2[%c3_28, %c0_29, %c0_30] : memref<5x32x128xbf16, #tpu.memory_space<vmem>>, vector<1x32x128xbf16>
    %25 = vector.shape_cast %24 : vector<1x32x128xbf16> to vector<32x128xbf16>
    %cst_31 = arith.constant dense<0.000000e+00> : vector<32x128xf32>
    %26 = tpu.matmul %23, %25, %cst_31 {dimension_numbers = #tpu.dot_dimension_numbers<[1], [0], [0], [1], [0, 0, 1, 1], [], []>} : vector<32x32xbf16>, vector<32x128xbf16>, vector<32x128xf32> -> vector<32x128xf32>
    %27 = arith.addf %21, %26 : vector<32x128xf32>
    %c0_32 = arith.constant 0 : index
    %c4 = arith.constant 4 : index
    %c0_33 = arith.constant 0 : index
    %28 = vector.load %arg7[%c0_32, %c4, %c0_33] : memref<2x20x32xbf16, #tpu.memory_space<vmem>>, vector<2x16x32xbf16>
    %29 = vector.shape_cast %28 : vector<2x16x32xbf16> to vector<32x32xbf16>
    %c4_34 = arith.constant 4 : index
    %c0_35 = arith.constant 0 : index
    %c0_36 = arith.constant 0 : index
    %30 = vector.load %arg2[%c4_34, %c0_35, %c0_36] : memref<5x32x128xbf16, #tpu.memory_space<vmem>>, vector<1x32x128xbf16>
    %31 = vector.shape_cast %30 : vector<1x32x128xbf16> to vector<32x128xbf16>
    %cst_37 = arith.constant dense<0.000000e+00> : vector<32x128xf32>
    %32 = tpu.matmul %29, %31, %cst_37 {dimension_numbers = #tpu.dot_dimension_numbers<[1], [0], [0], [1], [0, 0, 1, 1], [], []>} : vector<32x32xbf16>, vector<32x128xbf16>, vector<32x128xf32> -> vector<32x128xf32>
    %33 = arith.addf %27, %32 : vector<32x128xf32>
    %34 = vector.shape_cast %33 : vector<32x128xf32> to vector<2x16x128xf32>
    %c0_38 = arith.constant 0 : index
    %c0_39 = arith.constant 0 : index
    %35 = vector.load %arg3[%c0_38, %c0_39] : memref<16x128xf32, #tpu.memory_space<vmem>>, vector<16x128xf32>
    %36 = vector.shape_cast %35 : vector<16x128xf32> to vector<1x16x128xf32>
    %37 = vector.broadcast %36 : vector<1x16x128xf32> to vector<2x16x128xf32>
    %38 = arith.addf %34, %37 : vector<2x16x128xf32>
    %cst_40 = arith.constant 0.000000e+00 : f32
    %39 = vector.broadcast %cst_40 : f32 to vector<2x16x128xf32>
    %40 = arith.maximumf %38, %39 : vector<2x16x128xf32>
    %cst_41 = arith.constant dense<0xFF800000> : vector<2x128xf32>
    %41 = vector.multi_reduction <maximumf>, %40, %cst_41 [1] : vector<2x16x128xf32> to vector<2x128xf32>
    %42 = arith.truncf %41 : vector<2x128xf32> to vector<2x128xbf16>
    %c0_42 = arith.constant 0 : index
    %c0_43 = arith.constant 0 : index
    %43 = vector.load %arg4[%c0_42, %c0_43] : memref<128x128xbf16, #tpu.memory_space<vmem>>, vector<128x128xbf16>
    %cst_44 = arith.constant dense<0.000000e+00> : vector<2x128xf32>
    %44 = tpu.matmul %42, %43, %cst_44 {dimension_numbers = #tpu.dot_dimension_numbers<[1], [0], [0], [1], [0, 0, 1, 1], [], []>} : vector<2x128xbf16>, vector<128x128xbf16>, vector<2x128xf32> -> vector<2x128xf32>
    %c0_45 = arith.constant 0 : index
    %c0_46 = arith.constant 0 : index
    %45 = vector.load %arg5[%c0_45, %c0_46] : memref<1x128xf32, #tpu.memory_space<vmem>>, vector<1x128xf32>
    %46 = vector.broadcast %45 : vector<1x128xf32> to vector<2x128xf32>
    %47 = arith.addf %44, %46 : vector<2x128xf32>
    %cst_47 = arith.constant dense<0xFF800000> : vector<2xf32>
    %48 = vector.multi_reduction <maximumf>, %47, %cst_47 [1] : vector<2x128xf32> to vector<2xf32>
    %49 = vector.shape_cast %48 : vector<2xf32> to vector<2x1xf32>
    %50 = vector.broadcast %49 : vector<2x1xf32> to vector<2x128xf32>
    %51 = arith.subf %47, %50 : vector<2x128xf32>
    %52 = math.exp %51 : vector<2x128xf32>
    %cst_48 = arith.constant dense<0.000000e+00> : vector<2xf32>
    %53 = vector.multi_reduction <add>, %52, %cst_48 [1] : vector<2x128xf32> to vector<2xf32>
    %54 = vector.shape_cast %53 : vector<2xf32> to vector<2x1xf32>
    %55 = tpu.reciprocal %54 {approx = true} : vector<2x1xf32> -> vector<2x1xf32>
    %56 = vector.broadcast %55 : vector<2x1xf32> to vector<2x128xf32>
    %57 = arith.mulf %52, %56 : vector<2x128xf32>
    %c0_49 = arith.constant 0 : index
    %c0_50 = arith.constant 0 : index
    %58 = vector.load %arg6[%c0_49, %c0_50] : memref<2x128xf32, #tpu.memory_space<vmem>>, vector<2x128xf32>
    tpu.vector_store %arg6[%c0_49, %c0_50], %57 {strides = array<i32>} : memref<2x128xf32, #tpu.memory_space<vmem>>, vector<2x128xf32>,
    return
  }
  func.func @transform_0(%arg0: i32) -> (i32, i32, i32) {
    %c0_i32 = arith.constant 0 : i32
    %c0_i32_0 = arith.constant 0 : i32
    %c0_i32_1 = arith.constant 0 : i32
    return %arg0, %c0_i32, %c0_i32_0 : i32, i32, i32
  }
  func.func @transform_1(%arg0: i32) -> (i32, i32, i32) {
    %c0_i32 = arith.constant 0 : i32
    %c0_i32_0 = arith.constant 0 : i32
    %c0_i32_1 = arith.constant 0 : i32
    %c0_i32_2 = arith.constant 0 : i32
    return %c0_i32, %c0_i32_0, %c0_i32_1 : i32, i32, i32
  }
  func.func @transform_2(%arg0: i32) -> (i32, i32) {
    %c0_i32 = arith.constant 0 : i32
    %c0_i32_0 = arith.constant 0 : i32
    %c0_i32_1 = arith.constant 0 : i32
    return %c0_i32, %c0_i32_0 : i32, i32
  }
  func.func @transform_3(%arg0: i32) -> (i32, i32) {
    %c0_i32 = arith.constant 0 : i32
    %c0_i32_0 = arith.constant 0 : i32
    %c0_i32_1 = arith.constant 0 : i32
    return %c0_i32, %c0_i32_0 : i32, i32
  }
  func.func @transform_4(%arg0: i32) -> (i32, i32) {
    %c0_i32 = arith.constant 0 : i32
    %c0_i32_0 = arith.constant 0 : i32
    %c0_i32_1 = arith.constant 0 : i32
    return %c0_i32, %c0_i32_0 : i32, i32
  }
  func.func @transform_5(%arg0: i32) -> (i32, i32) {
    %c0_i32 = arith.constant 0 : i32
    %c0_i32_0 = arith.constant 0 : i32
    return %arg0, %c0_i32 : i32, i32
  }
}

</mosaic_0001>

<bundles_post_ra>
// kernel: tpu_custom_call.1
= control target key start
LH: loop header
LB: loop body
LE: loop exit
PB: predicated region body
PF: predicated region fallthrough
CT: control target
= control target key end

     0   :  { %10 = vsyncpa [#allocation4], 0  ;;  %s1384_s0 = inlined_call_operand.hbm [shape: f32[2,16,32], index: 0, kind: input, shape index: {}]   ;;  %s1385_s1 = inlined_call_operand.hbm [shape: bf16[5,32,128], index: 1, kind: input, shape index: {}]   ;;  %s1386_s2 = inlined_call_operand.hbm [shape: f32[16,128], index: 2, kind: input, shape index: {}]   ;;  %s1387_s3 = inlined_call_operand.hbm [shape: bf16[128,128], index: 3, kind: input, shape index: {}]   ;;  %s1388_s4 = inlined_call_operand.vmem [shape: f32[1,128], index: 4, kind: input, shape index: {}]   ;;  %s1389_s5 = inlined_call_operand.hbm [shape: f32[2,128], index: 5, kind: output, shape index: {}]  }
   0x1   :  { %11 = vsyncpa [#allocation7], 0 }
   0x2   :  { %12 = vsyncpa [#allocation10], 0 }
   0x3   :  { %13 = vsyncpa [#allocation5], 0  ;;  %s1149_s18 = smov [#allocation6]   ;;  %s1031_s22 = scalar_lea.hbm %s1385_s1, 1280 }
   0x4   :  { %s31_s19 = sshll.u32 %s1149_s18, 4  ;;  %p1032_p0 = scmp.ne.s32.totalorder %s1385_s1, %s1031_s22  ;;  %s32_s19 = int_to_ptr.vmem [resolvable:$true] %s31_s19 }
   0x5   :  { %p1035_p1 = scmp.lt.u32.totalorder %s1031_s22, %s1385_s1 }
   0x7   :  { %p1037_p2 = pnand %p1035_p1, %p1032_p0 }
   0x9   :  { %1040 = shalt.err (!%p1037_p2)
}
   0xa   :  { %s1041_s27 = scalar_lea.vmem %s32_s19, 1280  ;;  %p1046_p4 = scmp.lt.s32.totalorder %s32_s19, %s32_s19 }
   0xb   :  { %p1042_p3 = scmp.ne.s32.totalorder %s32_s19, %s1041_s27  ;;  %p1047_p5 = scmp.lt.s32.totalorder %s1041_s27, %s1041_s27 }
   0xd   :  { %p1048_p6 = por %p1047_p5, %p1046_p4 }
   0xf   :  { %p1049_p7 = pnand %p1048_p6, %p1042_p3 }
  0x11   :  { %1052 = shalt.err (!%p1049_p7)
}
  0x12   :  { %s1150_s28 = smov 64   ;;  %s1151_s29 = smov 4  }
  0x13   :  { %37 = dma.hbm_to_vmem [thread:$0]  %s1385_s1, 1280, %s32_s19, [#allocation7], %s1150_s28, %s1150_s28, %s1151_s29  }
  0x14   :  { %s1152_s7 = smov [#allocation3]   ;;  %s1053_s11 = scalar_lea.hbm %s1384_s0, 512 }
  0x15   :  { %s19_s8 = sshll.u32 %s1152_s7, 4  ;;  %p1054_p8 = scmp.ne.s32.totalorder %s1384_s0, %s1053_s11  ;;  %s20_s8 = int_to_ptr.vmem [resolvable:$true] %s19_s8 }
  0x16   :  { %p1057_p9 = scmp.lt.u32.totalorder %s1053_s11, %s1384_s0 }
  0x18   :  { %p1059_p10 = pnand %p1057_p9, %p1054_p8 }
  0x1a   :  { %1062 = shalt.err (!%p1059_p10)
}
  0x1b   :  { %s1063_s16 = scalar_lea.vmem %s20_s8, 512  ;;  %p1068_p12 = scmp.lt.s32.totalorder %s20_s8, %s20_s8 }
  0x1c   :  { %p1064_p11 = scmp.ne.s32.totalorder %s20_s8, %s1063_s16  ;;  %p1069_p13 = scmp.lt.s32.totalorder %s1063_s16, %s1063_s16 }
  0x1e   :  { %p1070_p0 = por %p1069_p13, %p1068_p12 }
  0x20   :  { %p1071_p1 = pnand %p1070_p0, %p1064_p11 }
  0x22   :  { %1074 = shalt.err (!%p1071_p1)
}
  0x23   :  { %s1153_s1 = smov 128   ;;  %s1154_s17 = smov 8  }
  0x24   :  { %25 = dma.hbm_to_vmem [thread:$0]  %s1384_s0, 512, %s20_s8, [#allocation4], %s1153_s1, %s1153_s1, %s1154_s17  }
  0x25   :  { %s1155_s20 = smov [#allocation8]   ;;  %s1156_s22 = smov [#allocation9]  }
  0x26   :  { %s43_s21 = sshll.u32 %s1155_s20, 4  ;;  %s55_s23 = sshll.u32 %s1156_s22, 4  ;;  %s44_s21 = int_to_ptr.vmem [resolvable:$true] %s43_s21  ;;  %s1218_s23 = int_to_ptr.vmem [resolvable:$true] %s55_s23 }
  0x27   :  { %s1075_s26 = scalar_lea.hbm %s1386_s2, 256 }
  0x28   :  { %p1076_p2 = scmp.ne.s32.totalorder %s1386_s2, %s1075_s26  ;;  %p1079_p3 = scmp.lt.u32.totalorder %s1075_s26, %s1386_s2 }
  0x2a   :  { %p1081_p4 = pnand %p1079_p3, %p1076_p2 }
  0x2c   :  { %1084 = shalt.err (!%p1081_p4)
}
  0x2d   :  { %s1085_s0 = scalar_lea.vmem %s44_s21, 256  ;;  %p1090_p6 = scmp.lt.s32.totalorder %s44_s21, %s44_s21 }
  0x2e   :  { %p1086_p5 = scmp.ne.s32.totalorder %s44_s21, %s1085_s0  ;;  %p1091_p7 = scmp.lt.s32.totalorder %s1085_s0, %s1085_s0 }
  0x30   :  { %p1092_p8 = por %p1091_p7, %p1090_p6 }
  0x32   :  { %p1093_p9 = pnand %p1092_p8, %p1086_p5 }
  0x34   :  { %1096 = shalt.err (!%p1093_p9)
}
  0x35   :  { %49 = dma.hbm_to_vmem [thread:$0]  %s1386_s2, 256, %s44_s21, [#allocation7], %s1153_s1, %s1153_s1, %s1154_s17  }
  0x36   :  { %s1097_s12 = scalar_lea.hbm %s1387_s3, 1024 }
  0x37   :  { %p1098_p10 = scmp.ne.s32.totalorder %s1387_s3, %s1097_s12  ;;  %p1101_p11 = scmp.lt.u32.totalorder %s1097_s12, %s1387_s3 }
  0x39   :  { %p1103_p12 = pnand %p1101_p11, %p1098_p10 }
  0x3b   :  { %1106 = shalt.err (!%p1103_p12)
}
  0x3c   :  { %s1107_s18 = scalar_lea.vmem %s1218_s23, 1024  ;;  %p1112_p0 = scmp.lt.s32.totalorder %s1218_s23, %s1218_s23 }
  0x3d   :  { %p1108_p13 = scmp.ne.s32.totalorder %s1218_s23, %s1107_s18  ;;  %p1113_p1 = scmp.lt.s32.totalorder %s1107_s18, %s1107_s18 }
  0x3f   :  { %p1114_p2 = por %p1113_p1, %p1112_p0 }
  0x41   :  { %p1115_p3 = pnand %p1114_p2, %p1108_p13 }
  0x43   :  { %1118 = shalt.err (!%p1115_p3)
}
  0x44   :  { %61 = dma.hbm_to_vmem [thread:$0]  %s1387_s3, 1024, %s1218_s23, [#allocation10], %s1150_s28, %s1150_s28, %s1151_s29  }
  0x45   :  { %1141 = dma.done.wait [#allocation4], 512  }
  0x46   :  { %1142 = vsyncadd [#allocation4], 4294966784 }
  0x47   :  { %1143 = dma.done.wait [#allocation7], 1536  }
  0x48   :  { %1144 = vsyncadd [#allocation7], 4294965760 }
  0x49   :  { %1145 = dma.done.wait [#allocation10], 1024  }
  0x4a   :  { %1146 = vsyncadd [#allocation10], 4294966272  ;;  %vm102_vm0 = vcmask 254976   ;;  %v1157_v0 = vmov 0   ;;  %v1158_v1 = vmov 0.0   ;;  %v1008_v2 = vld [vmem:[#allocation6 + $0x10] sm:$0xff]  }
  0x4b   :  { %103 = vst.msk [vmem:[#allocation2 + $0x8] sm:$0x3] %vm102_vm0, %v1157_v0  ;;  %104 = vst.msk [vmem:[#allocation2 + $0x14] sm:$0x3] %vm102_vm0, %v1157_v0  ;;  %960 = vmatprep.subr.bf16.mxu1 %v1158_v1  ;;  %v1009_v3 = vld [vmem:[#allocation6 + $0x18] sm:$0xff]   ;;  %920 = vmatprep.subr.bf16.mxu0 %v1008_v2  ;;  %v77_v4 = vld [vmem:[#allocation3] sm:$0xff] }
  0x4c   :  { %v78_v5 = vld [vmem:[#allocation3 + $0x8] sm:$0xff]  ;;  %v80_v6 = vld [vmem:[#allocation3 + $0x18] sm:$0xff]  ;;  %vm97_vm1 = vcmask 257024   ;;  %921 = vmatpush3.bf16.msra.mxu0 %v1008_v2  ;;  %v887_v7 = vpack.c.bf16 %v77_v4, %v77_v4  ;;  %v1253_v10 = vld [vmem:[#allocation6] sm:$0xff]   ;;  %vm115_vm2 = vsmask.f32 3328 }
  0x4d   :  { %v888_v8 = vpack.c.bf16 %v78_v5, %v78_v5  ;;  %v890_v9 = vpack.c.bf16 %v80_v6, %v80_v6  ;;  %922 = vmatprep.subr.bf16.mxu0 %v1009_v3  ;;  %v79_v11 = vld [vmem:[#allocation3 + $0x10] sm:$0xff]  ;;  %vm116_vm3 = vsmask.f32 7440  ;;  %v1019_v27 = vld [vmem:[#allocation9] sm:$0xff]   ;;  %vm189_vm5 = vcmask 261120   ;;  %v1011_v56 = vld [vmem:[#allocation6 + $0x8] sm:$0xff]  }
  0x4e   :  { %98 = vst.msk [vmem:[#allocation2] sm:$0xf] %vm97_vm1, %v887_v7  ;;  %v889_v12 = vpack.c.bf16 %v79_v11, %v79_v11  ;;  %961 = vmatpush3.bf16.msra.mxu1 %v1019_v27  ;;  %vm1281_vm4 = vmor %vm115_vm2, %vm116_vm3  ;;  %vm328_vm6 = vcmask 1042432   ;;  %vm329_vm7 = vcmask 1046532   ;;  %v1012_v60 = vld [vmem:[#allocation6 + $0x20] sm:$0xff]   ;;  %vm566_vm12 = vcmask 1041408  }
  0x4f   :  { %99 = vst.msk [vmem:[#allocation2 + $0x4] sm:$0xf] %vm97_vm1, %v888_v8  ;;  %101 = vst.msk [vmem:[#allocation2 + $0x10] sm:$0xf] %vm97_vm1, %v890_v9  ;;  %962 = vmatprep.subr.bf16.mxu1 %v1158_v1  ;;  %vm429_vm9 = vsmask.f32 2304 }
  0x50   :  { %923 = vmatpush3.bf16.msra.mxu0 %v1009_v3  ;;  %100 = vst.msk [vmem:[#allocation2 + $0xc] sm:$0xf] %vm97_vm1, %v889_v12  ;;  %vm1302_vm8 = vmor %vm328_vm6, %vm329_vm7  ;;  %vm430_vm10 = vsmask.f32 6416  ;;  %vm567_vm13 = vcmask 1045508   ;;  %vm1159_vm15 = vmmov 0  }
  0x51   :  { %928 = vmatprep.subr.bf16.mxu0 %v1253_v10  ;;  %vm1319_vm11 = vmor %vm429_vm9, %vm430_vm10  ;;  %976 = vmatprep.mubr.msk.bf16.mxu1 %vm1159_vm15, %v1158_v1  ;;  %vm718_vm0 = vcmask 1041409   ;;  %s1160_s29 = smov [#allocation11]  }
  0x52   :  { %v1255_v13 = vld [vmem:[#allocation2 + $0x8] sm:$0x1]  ;;  %v1259_v15 = vld [vmem:[#allocation2 + $0x14] sm:$0x1]  ;;  %vm1340_vm14 = vmor %vm566_vm12, %vm567_vm13 }
  0x53   :  { %v138_v14 = vshll.u32 %v1255_v13, 16  ;;  %v162_v26 = vshll.u32 %v1259_v15, 16  ;;  %v336_v59 = vrot.slane %v1255_v13, 5  ;;  %v1300_v61 = vld [vmem:[#allocation2 + $0x8] sm:$0x3]  ;;  %v343_v27 = vrot.slane %v1259_v15, 5 }
  0x54   :  { %v447_v6 = vshrl.u32 %v1300_v61, 16  ;;  %v450_v7 = vshll.u32 %v1300_v61, 16 }
  0x55   :  { %v105_v16 = vld [vmem:[#allocation2] sm:$0xf]  ;;  %v140_v32 = vrot.slane %v138_v14, 5  ;;  %v164_v45 = vrot.slane %v162_v26, 5 }
  0x56   :  { %v1261_v17 = vld [vmem:[#allocation2 + $0x4] sm:$0xf]  ;;  %v1263_v18 = vld [vmem:[#allocation2 + $0x10] sm:$0xf]  ;;  %v119_v19 = vshrl.u32 %v105_v16, 16  ;;  %v122_v20 = vshll.u32 %v105_v16, 16 }
  0x57   :  { %v128_v21 = vshll.u32 %v1261_v17, 16  ;;  %v132_v22 = vshrl.u32 %v1261_v17, 16  ;;  %v1267_v23 = vld [vmem:[#allocation2 + $0xc] sm:$0xf]  ;;  %v152_v24 = vshll.u32 %v1263_v18, 16  ;;  %v156_v25 = vshrl.u32 %v1263_v18, 16 }
  0x58   :  { %v121_v28 = vrot.slane %v119_v19, 4  ;;  %v124_v29 = vrot.slane %v122_v20, 5  ;;  %v143_v33 = vshrl.u32 %v1267_v23, 16  ;;  %v146_v34 = vshll.u32 %v1267_v23, 16  ;;  %v322_v58 = vld [vmem:[#allocation2] sm:$0xe] }
  0x59   :  { %v130_v30 = vrot.slane %v128_v21, 5  ;;  %v134_v31 = vrot.slane %v132_v22, 4  ;;  %v154_v37 = vrot.slane %v152_v24, 5  ;;  %v158_v38 = vrot.slane %v156_v25, 4  ;;  %v1014_v19 = vld [vmem:[#allocation6 + $0x28] sm:$0xff]  }
  0x5a   :  { %v125_v35 = vor.u32 %v124_v29, %v121_v28  ;;  %v145_v40 = vrot.slane %v143_v33, 4  ;;  %v148_v41 = vrot.slane %v146_v34, 5  ;;  %v850_v54 = vcombine.low %v105_v16, %v1261_v17  ;;  %v323_v16 = vld [vmem:[#allocation2 + $0xc] sm:$0xe] }
  0x5b   :  { %v135_v36 = vor.u32 %v134_v31, %v130_v30  ;;  %v159_v44 = vor.u32 %v158_v38, %v154_v37  ;;  %v333_v57 = vrot.slane %v1261_v17, 5  ;;  %v856_v62 = vrot.slane %v322_v58, 9  ;;  %v1015_v31 = vld [vmem:[#allocation6 + $0x30] sm:$0xff]  }
  0x5c   :  { %v126_v42 = vrot.slane %v125_v35, 4  ;;  %v149_v46 = vor.u32 %v148_v41, %v145_v40  ;;  %v433_v0 = vshrl.u32 %v322_v58, 16  ;;  %v436_v2 = vshll.u32 %v322_v58, 16  ;;  %v428_v35 = vld [vmem:[#allocation2 + $0x14] sm:$0x3] }
  0x5d   :  { %v136_v43 = vrot.slane %v135_v36, 4  ;;  %v160_v49 = vrot.slane %v159_v44, 4  ;;  %v335_v63 = vrot.slane %v333_v57, 4  ;;  %v441_v4 = vrot.slane %v132_v22, 5 }
  0x5e   :  { %v131_v47 = vsel %vm1281_vm4, %v126_v42, %v130_v30  ;;  %v150_v51 = vrot.slane %v149_v46, 4  ;;  %v442_v5 = vrot.slane %v128_v21, 6  ;;  %v334_v8 = vsel %vm1302_vm8, %v856_v62, %v333_v57 }
  0x5f   :  { %v141_v48 = vsel %vm1281_vm4, %v136_v43, %v140_v32  ;;  %v165_v52 = vsel %vm1281_vm4, %v160_v49, %v164_v45  ;;  %v337_v9 = vsel %vm1302_vm8, %v335_v63, %v336_v59  ;;  %v438_v11 = vrot.slane %v436_v2, 6 }
  0x60   :  { %v844_v50 = vcombine.low %v131_v47, %v141_v48  ;;  %v155_v53 = vsel %vm1281_vm4, %v150_v51, %v154_v37  ;;  %v851_v12 = vcombine.low %v1267_v23, %v1263_v18  ;;  %v340_v13 = vrot.slane %v1263_v18, 5  ;;  %v1016_v51 = vld [vmem:[#allocation6 + $0x38] sm:$0xff]  }
  0x61   :  { %v845_v55 = vcombine.low %v155_v53, %v165_v52  ;;  %v858_v14 = vcombine.low %v334_v8, %v337_v9  ;;  %v443_v21 = vor.u32 %v442_v5, %v441_v4  ;;  %v449_v22 = vrot.slane %v447_v6, 5  ;;  %v560_v52 = vld [vmem:[#allocation2] sm:$0xc]  ;;  %v561_v5 = vld [vmem:[#allocation2 + $0xc] sm:$0xc] }
  0x62   :  { %924 = vmatprep.mubr.msk.bf16.mxu0 %vm189_vm5, %v844_v50  ;;  %v452_v26 = vrot.slane %v450_v7, 6  ;;  %v857_v28 = vrot.slane %v323_v16, 9  ;;  %v342_v29 = vrot.slane %v340_v13, 4  ;;  %v456_v23 = vshrl.u32 %v323_v16, 16  ;;  %v1018_v4 = vld [vmem:[#allocation6 + $0x48] sm:$0xff]  }
  0x63   :  { %925 = vmatmul.mubr.msk.bf16.vlgmr.msra.gmra.mrb[0].mxu0 %vm189_vm5, %v845_v55  ;;  %v459_v30 = vshll.u32 %v323_v16, 16  ;;  %v445_v33 = vrot.slane %v443_v21, 4  ;;  %v465_v15 = vrot.slane %v152_v24, 6  ;;  %v464_v39 = vrot.slane %v156_v25, 5  ;;  %v1024_v16 = vld [vmem:[#allocation9 + $0x28] sm:$0xff]  }
  0x64   :  { %929 = vmatpush3.bf16.msra.mxu0 %v1253_v10  ;;  %932 = vmatprep.mubr.msk.bf16.mxu0 %vm189_vm5, %v850_v54  ;;  %v435_v10 = vrot.slane %v433_v0, 5  ;;  %v453_v34 = vor.u32 %v452_v26, %v449_v22  ;;  %v341_v37 = vsel %vm1302_vm8, %v857_v28, %v340_v13  ;;  %v344_v38 = vsel %vm1302_vm8, %v342_v29, %v343_v27  ;;  %v1022_v13 = vld [vmem:[#allocation9 + $0x18] sm:$0xff]  }
  0x65   :  { %930 = vmatprep.subr.bf16.mxu0 %v1011_v56  ;;  %v458_v40 = vrot.slane %v456_v23, 5  ;;  %v461_v41 = vrot.slane %v459_v30, 6  ;;  %v470_v42 = vshrl.u32 %v428_v35, 16  ;;  %v473_v43 = vshll.u32 %v428_v35, 16  ;;  %v666_v26 = vld [vmem:[#allocation8 + $0x8] sm:$0xff] }
  0x66   :  { %v439_v20 = vor.u32 %v438_v11, %v435_v10  ;;  %v454_v24 = vsel %vm1319_vm11, %v445_v33, %v453_v34  ;;  %v859_v45 = vcombine.low %v341_v37, %v344_v38  ;;  %v466_v46 = vor.u32 %v465_v15, %v464_v39 }
  0x67   :  { %v462_v48 = vor.u32 %v461_v41, %v458_v40  ;;  %v472_v49 = vrot.slane %v470_v42, 5  ;;  %v475_v50 = vrot.slane %v473_v43, 6  ;;  %v571_v25 = vrot.slane %v1261_v17, 6 }
  0x68   :  { %931 = vmatpush3.bf16.msra.mxu0 %v1011_v56  ;;  %v440_v32 = vrot.slane %v439_v20, 4  ;;  %v468_v54 = vrot.slane %v466_v46, 4  ;;  %v1017_v56 = vld [vmem:[#allocation6 + $0x40] sm:$0xff]   ;;  %v870_v57 = vrot.slane %v560_v52, 10  ;;  %v574_v59 = vrot.slane %v1300_v61, 6  ;;  %v1026_v20 = vld [vmem:[#allocation9 + $0x38] sm:$0xff]  }
  0x69   :  { %936 = vmatprep.subr.bf16.mxu0 %v1012_v60  ;;  %v463_v53 = vrot.slane %v462_v48, 4  ;;  %v476_v55 = vor.u32 %v475_v50, %v472_v49  ;;  %v573_v58 = vrot.slane %v571_v25, 4  ;;  %v578_v3 = vrot.slane %v1263_v18, 6  ;;  %v1020_v18 = vld [vmem:[#allocation9 + $0x8] sm:$0xff]  }
  0x6a   :  { %v444_v44 = vsel %vm1319_vm11, %v440_v32, %v443_v21  ;;  %v572_v63 = vsel %vm1340_vm14, %v870_v57, %v571_v25  ;;  %v871_v6 = vrot.slane %v561_v5, 10  ;;  %v581_v8 = vrot.slane %v428_v35, 6  ;;  %963 = vmatpush3.bf16.msra.mxu1 %v1020_v18  ;;  %v665_v21 = vld [vmem:[#allocation8] sm:$0xff] }
  0x6b   :  { %v864_v47 = vcombine.low %v444_v44, %v454_v24  ;;  %v477_v62 = vsel %vm1319_vm11, %v468_v54, %v476_v55  ;;  %v575_v0 = vsel %vm1340_vm14, %v573_v58, %v574_v59  ;;  %v580_v7 = vrot.slane %v578_v3, 4  ;;  %964 = vmatprep.subr.bf16.mxu1 %v1158_v1 }
  0x6c   :  { %v872_v2 = vcombine.low %v572_v63, %v575_v0  ;;  %v579_v9 = vsel %vm1340_vm14, %v871_v6, %v578_v3 }
  0x6d   :  { %v582_v10 = vsel %vm1340_vm14, %v580_v7, %v581_v8 }
  0x6e   :  { %v873_v11 = vcombine.low %v579_v9, %v582_v10 }
  0x6f   :  { %933 = vmatmul.mubr.msk.bf16.vlgmr.msra.gmra.mrb[0].mxu0 %vm189_vm5, %v851_v12  ;;  %v1021_v12 = vld [vmem:[#allocation9 + $0x10] sm:$0xff]  }
  0x70   :  { %937 = vmatpush3.bf16.msra.mxu0 %v1012_v60  ;;  %940 = vmatprep.mubr.msk.bf16.mxu0 %vm189_vm5, %v858_v14  ;;  %v467_v60 = vsel %vm1319_vm11, %v463_v53, %v466_v46  ;;  %v1023_v14 = vld [vmem:[#allocation9 + $0x20] sm:$0xff]   ;;  %v878_v53 = vld [vmem:[%s1388_s4] ss:$0 sm:$0xff]  ;;  %s829_s4 = sshll.u32 %s1160_s29, 4  ;;  %s830_s4 = int_to_ptr.vmem [resolvable:$true] %s829_s4 }
  0x71   :  { %938 = vmatprep.subr.bf16.mxu0 %v1014_v19  ;;  %v865_v61 = vcombine.low %v467_v60, %v477_v62  ;;  %965 = vmatpush3.bf16.msra.mxu1 %v1021_v12  ;;  %s1119_s17 = scalar_lea.vmem %s830_s4, 32  ;;  %p1124_p5 = scmp.lt.s32.totalorder %s830_s4, %s830_s4 }
  0x72   :  { %966 = vmatprep.subr.bf16.mxu1 %v1158_v1  ;;  %p1120_p4 = scmp.ne.s32.totalorder %s830_s4, %s1119_s17  ;;  %p1125_p6 = scmp.lt.s32.totalorder %s1119_s17, %s1119_s17 }
  0x74   :  { %939 = vmatpush3.bf16.msra.mxu0 %v1014_v19  ;;  %v1025_v19 = vld [vmem:[#allocation9 + $0x30] sm:$0xff]   ;;  %p1126_p7 = por %p1125_p6, %p1124_p5 }
  0x75   :  { %944 = vmatprep.subr.bf16.mxu0 %v1015_v31  ;;  %967 = vmatpush3.bf16.msra.mxu1 %v1022_v13 }
  0x76   :  { %968 = vmatprep.subr.bf16.mxu1 %v1158_v1  ;;  %p1127_p8 = pnand %p1126_p7, %p1120_p4 }
  0x79   :  { %969 = vmatpush3.bf16.msra.mxu1 %v1023_v14 }
  0x7a   :  { %970 = vmatprep.subr.bf16.mxu1 %v1158_v1 }
  0x7b   :  { %941 = vmatmul.mubr.msk.bf16.vlgmr.msra.gmra.mrb[0].mxu0 %vm189_vm5, %v859_v45 }
  0x7c   :  { %945 = vmatpush3.bf16.msra.mxu0 %v1015_v31  ;;  %948 = vmatprep.mubr.msk.bf16.mxu0 %vm189_vm5, %v864_v47 }
  0x7d   :  { %946 = vmatprep.subr.bf16.mxu0 %v1016_v51  ;;  %971 = vmatpush3.bf16.msra.mxu1 %v1024_v16 }
  0x7e   :  { %972 = vmatprep.subr.bf16.mxu1 %v1158_v1 }
  0x80   :  { %947 = vmatpush3.bf16.msra.mxu0 %v1016_v51 }
  0x81   :  { %952 = vmatprep.subr.bf16.mxu0 %v1017_v56  ;;  %973 = vmatpush3.bf16.msra.mxu1 %v1025_v19 }
  0x82   :  { %974 = vmatprep.subr.bf16.mxu1 %v1158_v1 }
  0x85   :  { %975 = vmatpush3.bf16.msra.mxu1 %v1026_v20 }
  0x87   :  { %949 = vmatmul.mubr.msk.bf16.vlgmr.msra.gmra.mrb[0].mxu0 %vm189_vm5, %v865_v61 }
  0x88   :  { %953 = vmatpush3.bf16.msra.mxu0 %v1017_v56  ;;  %956 = vmatprep.mubr.msk.bf16.mxu0 %vm189_vm5, %v872_v2 }
  0x89   :  { %954 = vmatprep.subr.bf16.mxu0 %v1018_v4 }
  0x8c   :  { %955 = vmatpush3.bf16.msra.mxu0 %v1018_v4 }
  0x93   :  { %957 = vmatmul.mubr.msk.bf16.vlgmr.msra.gmra.mrb[0].mxu0 %vm189_vm5, %v873_v11 }
 0x166   :  { %v958_v22 = vpop.f32.mrb[0].mxu0 }
 0x167   :  { %v669_v27 = vadd.f32 %v958_v22, %v665_v21  ;;  %v646_v28 = vpop.f32.mrb[1].mxu0 }
 0x168   :  { %v667_v29 = vadd.f32 %v665_v21, %v646_v28  ;;  %v959_v23 = vpop.f32.mrb[2].mxu0 }
 0x169   :  { %v670_v30 = vadd.f32 %v959_v23, %v666_v26  ;;  %v649_v31 = vpop.f32.mrb[3].mxu0  ;;  %v673_v33 = vmax.f32 %v669_v27, 0.0 }
 0x16a   :  { %v668_v32 = vadd.f32 %v666_v26, %v649_v31  ;;  %v671_v35 = vmax.f32 %v667_v29, 0.0 }
 0x16b   :  { %v674_v34 = vmax.f32 %v670_v30, 0.0 }
 0x16c   :  { %v672_v36 = vmax.f32 %v668_v32, 0.0 }
 0x16d   :  { %v682_v15 = vmax.f32 %v673_v33, %v674_v34 }
 0x16e   :  { %v675_v37 = vmax.f32 %v671_v35, %v672_v36 }
 0x16f   :  { %v683_v38 = vrot.slane %v682_v15, 4 }
 0x170   :  { %v676_v39 = vrot.slane %v675_v37, 4 }
 0x171   :  { %v684_v1 = vmax.f32 %v682_v15, %v683_v38 }
 0x172   :  { %v677_v40 = vmax.f32 %v675_v37, %v676_v39 }
 0x173   :  { %v685_v41 = vrot.slane %v684_v1, 2 }
 0x174   :  { %v678_v42 = vrot.slane %v677_v40, 2 }
 0x175   :  { %v686_v43 = vmax.f32 %v684_v1, %v685_v41 }
 0x176   :  { %v679_v44 = vmax.f32 %v677_v40, %v678_v42 }
 0x177   :  { %v687_v24 = vrot.slane %v686_v43, 1 }
 0x178   :  { %v680_v45 = vrot.slane %v679_v44, 1 }
 0x179   :  { %v688_v46 = vmax.f32 %v686_v43, %v687_v24 }
 0x17a   :  { %v681_v47 = vmax.f32 %v679_v44, %v680_v45 }
 0x17b   :  { %v690_v48 = vpack.c.bf16 %v688_v46, %v688_v46 }
 0x17c   :  { %v689_v49 = vpack.c.bf16 %v681_v47, %v681_v47 }
 0x17d   :  { %v717_v50 = vunpack.c.l.b16 %v690_v48 }
 0x17e   :  { %v716_v51 = vunpack.c.l.b16 %v689_v49 }
 0x180   :  { %v719_v25 = vsel %vm718_vm0, %v717_v50, %v716_v51 }
 0x181   :  { %v720_v52 = vpack.c.b16 %v719_v25, %v719_v25 }
 0x183   :  { %977 = vmatmul.mubr.bf16.vlgmr.msra.gmra.mrb[0].mxu1 %v720_v52 }
 0x256   :  { %v804_v54 = vpop.f32.mrb[0].mxu1 }
 0x257   :  { %v805_v55 = vadd.f32 %v878_v53, %v804_v54  ;;  %v978_v56 = vpop.f32.mrb[1].mxu1 }
 0x258   :  { %v807_v57 = vpop.f32.mrb[2].mxu1 }
 0x259   :  { %v979_v58 = vpop.f32.mrb[3].mxu1  ;;  %v811_v59 = vsel %vm566_vm12, %v805_v55, -inf }
 0x25a   :  { %812 = vmax.xlane.f32.xlu0 %v811_v59 }
 0x2e7   :  { %v813_v17 = vpop.xlane.xlu0 %812 }
 0x2e8   :  { %v814_v60 = vsub.f32 %v805_v55, %v813_v17 }
 0x2ea   :  { %v815_v62 = vmul.f32 1.442695, %v814_v60 }
 0x2ec   :  { %1027 = vpow2.f32 %v815_v62 }
 0x2f6   :  { %v1028_v63 = vpop.eup %1027 }
 0x2f7   :  { %v817_v0 = vsel %vm566_vm12, %v1028_v63, 0.0 }
 0x2f8   :  { %818 = vadd.xlane.f32.xlu0 %v817_v0 }
 0x385   :  { %v819_v61 = vpop.xlane.xlu0 %818 }
 0x386   :  { %1029 = vrcp.f32 %v819_v61 }
 0x390   :  { %v1030_v2 = vpop.eup %1029 }
 0x391   :  { %v821_v3 = vmul.f32 %v1030_v2, %v1028_v63 }
 0x393   :  { %822 = vst [vmem:[#allocation11] sm:$0x3] %v821_v3 }
 0x394   :  { %1130 = shalt.err (!%p1127_p8)
}
 0x395   :  { %s1131_s21 = scalar_lea.hbm %s1389_s5, 32 }
 0x396   :  { %p1132_p9 = scmp.ne.s32.totalorder %s1389_s5, %s1131_s21  ;;  %p1135_p10 = scmp.lt.u32.totalorder %s1131_s21, %s1389_s5 }
 0x398   :  { %p1137_p11 = pnand %p1135_p10, %p1132_p9 }
 0x39a   :  { %1140 = shalt.err (!%p1137_p11)
}
 0x39b   :  { %832 = dma.vmem_to_hbm [thread:$0]  %s830_s4, 32, %s1389_s5, [#allocation5]  }
 0x39c   :  { %1147 = dma.done.wait [#allocation5], 32  }
 0x39d   :  { %1148 = vsyncadd [#allocation5], 4294967264 }
 0x39e   :  { %836 = vsyncpa [#allocation4], 1 }
 0x39f   :  { %837 = vsyncpa [#allocation7], 1 }
 0x3a0   :  { %838 = vsyncpa [#allocation10], 1 }
 0x3a1   :  { %839 = vsyncpa [#allocation5], 1 }

// kernel: tpu_custom_call.1
= control target key start
LH: loop header
LB: loop body
LE: loop exit
PB: predicated region body
PF: predicated region fallthrough
CT: control target
= control target key end

     0   :  { %10 = vsyncpa [#allocation4], 0  ;;  %s1384_s0 = inlined_call_operand.hbm [shape: f32[2,16,32], index: 0, kind: input, shape index: {}]   ;;  %s1385_s1 = inlined_call_operand.hbm [shape: bf16[5,32,128], index: 1, kind: input, shape index: {}]   ;;  %s1386_s2 = inlined_call_operand.hbm [shape: f32[16,128], index: 2, kind: input, shape index: {}]   ;;  %s1387_s3 = inlined_call_operand.hbm [shape: bf16[128,128], index: 3, kind: input, shape index: {}]   ;;  %s1388_s4 = inlined_call_operand.vmem [shape: f32[1,128], index: 4, kind: input, shape index: {}]   ;;  %s1389_s5 = inlined_call_operand.hbm [shape: f32[2,128], index: 5, kind: output, shape index: {}]  }
   0x1   :  { %11 = vsyncpa [#allocation7], 0 }
   0x2   :  { %12 = vsyncpa [#allocation10], 0 }
   0x3   :  { %13 = vsyncpa [#allocation5], 0  ;;  %s1149_s18 = smov [#allocation6]   ;;  %s1031_s22 = scalar_lea.hbm %s1385_s1, 1280 }
   0x4   :  { %s31_s19 = sshll.u32 %s1149_s18, 4  ;;  %p1032_p0 = scmp.ne.s32.totalorder %s1385_s1, %s1031_s22  ;;  %s32_s19 = int_to_ptr.vmem [resolvable:$true] %s31_s19 }
   0x5   :  { %p1035_p1 = scmp.lt.u32.totalorder %s1031_s22, %s1385_s1 }
   0x7   :  { %p1037_p2 = pnand %p1035_p1, %p1032_p0 }
   0x9   :  { %1040 = shalt.err (!%p1037_p2)
}
   0xa   :  { %s1041_s27 = scalar_lea.vmem %s32_s19, 1280  ;;  %p1046_p4 = scmp.lt.s32.totalorder %s32_s19, %s32_s19 }
   0xb   :  { %p1042_p3 = scmp.ne.s32.totalorder %s32_s19, %s1041_s27  ;;  %p1047_p5 = scmp.lt.s32.totalorder %s1041_s27, %s1041_s27 }
   0xd   :  { %p1048_p6 = por %p1047_p5, %p1046_p4 }
   0xf   :  { %p1049_p7 = pnand %p1048_p6, %p1042_p3 }
  0x11   :  { %1052 = shalt.err (!%p1049_p7)
}
  0x12   :  { %s1150_s28 = smov 64   ;;  %s1151_s29 = smov 4  }
  0x13   :  { %37 = dma.hbm_to_vmem [thread:$0]  %s1385_s1, 1280, %s32_s19, [#allocation7], %s1150_s28, %s1150_s28, %s1151_s29  }
  0x14   :  { %s1152_s7 = smov [#allocation3]   ;;  %s1053_s11 = scalar_lea.hbm %s1384_s0, 512 }
  0x15   :  { %s19_s8 = sshll.u32 %s1152_s7, 4  ;;  %p1054_p8 = scmp.ne.s32.totalorder %s1384_s0, %s1053_s11  ;;  %s20_s8 = int_to_ptr.vmem [resolvable:$true] %s19_s8 }
  0x16   :  { %p1057_p9 = scmp.lt.u32.totalorder %s1053_s11, %s1384_s0 }
  0x18   :  { %p1059_p10 = pnand %p1057_p9, %p1054_p8 }
  0x1a   :  { %1062 = shalt.err (!%p1059_p10)
}
  0x1b   :  { %s1063_s16 = scalar_lea.vmem %s20_s8, 512  ;;  %p1068_p12 = scmp.lt.s32.totalorder %s20_s8, %s20_s8 }
  0x1c   :  { %p1064_p11 = scmp.ne.s32.totalorder %s20_s8, %s1063_s16  ;;  %p1069_p13 = scmp.lt.s32.totalorder %s1063_s16, %s1063_s16 }
  0x1e   :  { %p1070_p0 = por %p1069_p13, %p1068_p12 }
  0x20   :  { %p1071_p1 = pnand %p1070_p0, %p1064_p11 }
  0x22   :  { %1074 = shalt.err (!%p1071_p1)
}
  0x23   :  { %s1153_s1 = smov 128   ;;  %s1154_s17 = smov 8  }
  0x24   :  { %25 = dma.hbm_to_vmem [thread:$0]  %s1384_s0, 512, %s20_s8, [#allocation4], %s1153_s1, %s1153_s1, %s1154_s17  }
  0x25   :  { %s1155_s20 = smov [#allocation8]   ;;  %s1156_s22 = smov [#allocation9]  }
  0x26   :  { %s43_s21 = sshll.u32 %s1155_s20, 4  ;;  %s55_s23 = sshll.u32 %s1156_s22, 4  ;;  %s44_s21 = int_to_ptr.vmem [resolvable:$true] %s43_s21  ;;  %s1218_s23 = int_to_ptr.vmem [resolvable:$true] %s55_s23 }
  0x27   :  { %s1075_s26 = scalar_lea.hbm %s1386_s2, 256 }
  0x28   :  { %p1076_p2 = scmp.ne.s32.totalorder %s1386_s2, %s1075_s26  ;;  %p1079_p3 = scmp.lt.u32.totalorder %s1075_s26, %s1386_s2 }
  0x2a   :  { %p1081_p4 = pnand %p1079_p3, %p1076_p2 }
  0x2c   :  { %1084 = shalt.err (!%p1081_p4)
}
  0x2d   :  { %s1085_s0 = scalar_lea.vmem %s44_s21, 256  ;;  %p1090_p6 = scmp.lt.s32.totalorder %s44_s21, %s44_s21 }
  0x2e   :  { %p1086_p5 = scmp.ne.s32.totalorder %s44_s21, %s1085_s0  ;;  %p1091_p7 = scmp.lt.s32.totalorder %s1085_s0, %s1085_s0 }
  0x30   :  { %p1092_p8 = por %p1091_p7, %p1090_p6 }
  0x32   :  { %p1093_p9 = pnand %p1092_p8, %p1086_p5 }
  0x34   :  { %1096 = shalt.err (!%p1093_p9)
}
  0x35   :  { %49 = dma.hbm_to_vmem [thread:$0]  %s1386_s2, 256, %s44_s21, [#allocation7], %s1153_s1, %s1153_s1, %s1154_s17  }
  0x36   :  { %s1097_s12 = scalar_lea.hbm %s1387_s3, 1024 }
  0x37   :  { %p1098_p10 = scmp.ne.s32.totalorder %s1387_s3, %s1097_s12  ;;  %p1101_p11 = scmp.lt.u32.totalorder %s1097_s12, %s1387_s3 }
  0x39   :  { %p1103_p12 = pnand %p1101_p11, %p1098_p10 }
  0x3b   :  { %1106 = shalt.err (!%p1103_p12)
}
  0x3c   :  { %s1107_s18 = scalar_lea.vmem %s1218_s23, 1024  ;;  %p1112_p0 = scmp.lt.s32.totalorder %s1218_s23, %s1218_s23 }
  0x3d   :  { %p1108_p13 = scmp.ne.s32.totalorder %s1218_s23, %s1107_s18  ;;  %p1113_p1 = scmp.lt.s32.totalorder %s1107_s18, %s1107_s18 }
  0x3f   :  { %p1114_p2 = por %p1113_p1, %p1112_p0 }
  0x41   :  { %p1115_p3 = pnand %p1114_p2, %p1108_p13 }
  0x43   :  { %1118 = shalt.err (!%p1115_p3)
}
  0x44   :  { %61 = dma.hbm_to_vmem [thread:$0]  %s1387_s3, 1024, %s1218_s23, [#allocation10], %s1150_s28, %s1150_s28, %s1151_s29  }
  0x45   :  { %1141 = dma.done.wait [#allocation4], 512  }
  0x46   :  { %1142 = vsyncadd [#allocation4], 4294966784 }
  0x47   :  { %1143 = dma.done.wait [#allocation7], 1536  }
  0x48   :  { %1144 = vsyncadd [#allocation7], 4294965760 }
  0x49   :  { %1145 = dma.done.wait [#allocation10], 1024  }
  0x4a   :  { %1146 = vsyncadd [#allocation10], 4294966272  ;;  %vm102_vm0 = vcmask 254976   ;;  %v1157_v0 = vmov 0   ;;  %v1158_v1 = vmov 0.0   ;;  %v1008_v2 = vld [vmem:[#allocation6 + $0x10] sm:$0xff]  }
  0x4b   :  { %103 = vst.msk [vmem:[#allocation2 + $0x8] sm:$0x3] %vm102_vm0, %v1157_v0  ;;  %104 = vst.msk [vmem:[#allocation2 + $0x14] sm:$0x3] %vm102_vm0, %v1157_v0  ;;  %960 = vmatprep.subr.bf16.mxu1 %v1158_v1  ;;  %v1009_v3 = vld [vmem:[#allocation6 + $0x18] sm:$0xff]   ;;  %920 = vmatprep.subr.bf16.mxu0 %v1008_v2  ;;  %v77_v4 = vld [vmem:[#allocation3] sm:$0xff] }
  0x4c   :  { %v78_v5 = vld [vmem:[#allocation3 + $0x8] sm:$0xff]  ;;  %v80_v6 = vld [vmem:[#allocation3 + $0x18] sm:$0xff]  ;;  %vm97_vm1 = vcmask 257024   ;;  %921 = vmatpush3.bf16.msra.mxu0 %v1008_v2  ;;  %v887_v7 = vpack.c.bf16 %v77_v4, %v77_v4  ;;  %v1253_v10 = vld [vmem:[#allocation6] sm:$0xff]   ;;  %vm115_vm2 = vsmask.f32 3328 }
  0x4d   :  { %v888_v8 = vpack.c.bf16 %v78_v5, %v78_v5  ;;  %v890_v9 = vpack.c.bf16 %v80_v6, %v80_v6  ;;  %922 = vmatprep.subr.bf16.mxu0 %v1009_v3  ;;  %v79_v11 = vld [vmem:[#allocation3 + $0x10] sm:$0xff]  ;;  %vm116_vm3 = vsmask.f32 7440  ;;  %v1019_v27 = vld [vmem:[#allocation9] sm:$0xff]   ;;  %vm189_vm5 = vcmask 261120   ;;  %v1011_v56 = vld [vmem:[#allocation6 + $0x8] sm:$0xff]  }
  0x4e   :  { %98 = vst.msk [vmem:[#allocation2] sm:$0xf] %vm97_vm1, %v887_v7  ;;  %v889_v12 = vpack.c.bf16 %v79_v11, %v79_v11  ;;  %961 = vmatpush3.bf16.msra.mxu1 %v1019_v27  ;;  %vm1281_vm4 = vmor %vm115_vm2, %vm116_vm3  ;;  %vm328_vm6 = vcmask 1042432   ;;  %vm329_vm7 = vcmask 1046532   ;;  %v1012_v60 = vld [vmem:[#allocation6 + $0x20] sm:$0xff]   ;;  %vm566_vm12 = vcmask 1041408  }
  0x4f   :  { %99 = vst.msk [vmem:[#allocation2 + $0x4] sm:$0xf] %vm97_vm1, %v888_v8  ;;  %101 = vst.msk [vmem:[#allocation2 + $0x10] sm:$0xf] %vm97_vm1, %v890_v9  ;;  %962 = vmatprep.subr.bf16.mxu1 %v1158_v1  ;;  %vm429_vm9 = vsmask.f32 2304 }
  0x50   :  { %923 = vmatpush3.bf16.msra.mxu0 %v1009_v3  ;;  %100 = vst.msk [vmem:[#allocation2 + $0xc] sm:$0xf] %vm97_vm1, %v889_v12  ;;  %vm1302_vm8 = vmor %vm328_vm6, %vm329_vm7  ;;  %vm430_vm10 = vsmask.f32 6416  ;;  %vm567_vm13 = vcmask 1045508   ;;  %vm1159_vm15 = vmmov 0  }
  0x51   :  { %928 = vmatprep.subr.bf16.mxu0 %v1253_v10  ;;  %vm1319_vm11 = vmor %vm429_vm9, %vm430_vm10  ;;  %976 = vmatprep.mubr.msk.bf16.mxu1 %vm1159_vm15, %v1158_v1  ;;  %vm718_vm0 = vcmask 1041409   ;;  %s1160_s29 = smov [#allocation11]  }
  0x52   :  { %v1255_v13 = vld [vmem:[#allocation2 + $0x8] sm:$0x1]  ;;  %v1259_v15 = vld [vmem:[#allocation2 + $0x14] sm:$0x1]  ;;  %vm1340_vm14 = vmor %vm566_vm12, %vm567_vm13 }
  0x53   :  { %v138_v14 = vshll.u32 %v1255_v13, 16  ;;  %v162_v26 = vshll.u32 %v1259_v15, 16  ;;  %v336_v59 = vrot.slane %v1255_v13, 5  ;;  %v1300_v61 = vld [vmem:[#allocation2 + $0x8] sm:$0x3]  ;;  %v343_v27 = vrot.slane %v1259_v15, 5 }
  0x54   :  { %v447_v6 = vshrl.u32 %v1300_v61, 16  ;;  %v450_v7 = vshll.u32 %v1300_v61, 16 }
  0x55   :  { %v105_v16 = vld [vmem:[#allocation2] sm:$0xf]  ;;  %v140_v32 = vrot.slane %v138_v14, 5  ;;  %v164_v45 = vrot.slane %v162_v26, 5 }
  0x56   :  { %v1261_v17 = vld [vmem:[#allocation2 + $0x4] sm:$0xf]  ;;  %v1263_v18 = vld [vmem:[#allocation2 + $0x10] sm:$0xf]  ;;  %v119_v19 = vshrl.u32 %v105_v16, 16  ;;  %v122_v20 = vshll.u32 %v105_v16, 16 }
  0x57   :  { %v128_v21 = vshll.u32 %v1261_v17, 16  ;;  %v132_v22 = vshrl.u32 %v1261_v17, 16  ;;  %v1267_v23 = vld [vmem:[#allocation2 + $0xc] sm:$0xf]  ;;  %v152_v24 = vshll.u32 %v1263_v18, 16  ;;  %v156_v25 = vshrl.u32 %v1263_v18, 16 }
  0x58   :  { %v121_v28 = vrot.slane %v119_v19, 4  ;;  %v124_v29 = vrot.slane %v122_v20, 5  ;;  %v143_v33 = vshrl.u32 %v1267_v23, 16  ;;  %v146_v34 = vshll.u32 %v1267_v23, 16  ;;  %v322_v58 = vld [vmem:[#allocation2] sm:$0xe] }
  0x59   :  { %v130_v30 = vrot.slane %v128_v21, 5  ;;  %v134_v31 = vrot.slane %v132_v22, 4  ;;  %v154_v37 = vrot.slane %v152_v24, 5  ;;  %v158_v38 = vrot.slane %v156_v25, 4  ;;  %v1014_v19 = vld [vmem:[#allocation6 + $0x28] sm:$0xff]  }
  0x5a   :  { %v125_v35 = vor.u32 %v124_v29, %v121_v28  ;;  %v145_v40 = vrot.slane %v143_v33, 4  ;;  %v148_v41 = vrot.slane %v146_v34, 5  ;;  %v850_v54 = vcombine.low %v105_v16, %v1261_v17  ;;  %v323_v16 = vld [vmem:[#allocation2 + $0xc] sm:$0xe] }
  0x5b   :  { %v135_v36 = vor.u32 %v134_v31, %v130_v30  ;;  %v159_v44 = vor.u32 %v158_v38, %v154_v37  ;;  %v333_v57 = vrot.slane %v1261_v17, 5  ;;  %v856_v62 = vrot.slane %v322_v58, 9  ;;  %v1015_v31 = vld [vmem:[#allocation6 + $0x30] sm:$0xff]  }
  0x5c   :  { %v126_v42 = vrot.slane %v125_v35, 4  ;;  %v149_v46 = vor.u32 %v148_v41, %v145_v40  ;;  %v433_v0 = vshrl.u32 %v322_v58, 16  ;;  %v436_v2 = vshll.u32 %v322_v58, 16  ;;  %v428_v35 = vld [vmem:[#allocation2 + $0x14] sm:$0x3] }
  0x5d   :  { %v136_v43 = vrot.slane %v135_v36, 4  ;;  %v160_v49 = vrot.slane %v159_v44, 4  ;;  %v335_v63 = vrot.slane %v333_v57, 4  ;;  %v441_v4 = vrot.slane %v132_v22, 5 }
  0x5e   :  { %v131_v47 = vsel %vm1281_vm4, %v126_v42, %v130_v30  ;;  %v150_v51 = vrot.slane %v149_v46, 4  ;;  %v442_v5 = vrot.slane %v128_v21, 6  ;;  %v334_v8 = vsel %vm1302_vm8, %v856_v62, %v333_v57 }
  0x5f   :  { %v141_v48 = vsel %vm1281_vm4, %v136_v43, %v140_v32  ;;  %v165_v52 = vsel %vm1281_vm4, %v160_v49, %v164_v45  ;;  %v337_v9 = vsel %vm1302_vm8, %v335_v63, %v336_v59  ;;  %v438_v11 = vrot.slane %v436_v2, 6 }
  0x60   :  { %v844_v50 = vcombine.low %v131_v47, %v141_v48  ;;  %v155_v53 = vsel %vm1281_vm4, %v150_v51, %v154_v37  ;;  %v851_v12 = vcombine.low %v1267_v23, %v1263_v18  ;;  %v340_v13 = vrot.slane %v1263_v18, 5  ;;  %v1016_v51 = vld [vmem:[#allocation6 + $0x38] sm:$0xff]  }
  0x61   :  { %v845_v55 = vcombine.low %v155_v53, %v165_v52  ;;  %v858_v14 = vcombine.low %v334_v8, %v337_v9  ;;  %v443_v21 = vor.u32 %v442_v5, %v441_v4  ;;  %v449_v22 = vrot.slane %v447_v6, 5  ;;  %v560_v52 = vld [vmem:[#allocation2] sm:$0xc]  ;;  %v561_v5 = vld [vmem:[#allocation2 + $0xc] sm:$0xc] }
  0x62   :  { %924 = vmatprep.mubr.msk.bf16.mxu0 %vm189_vm5, %v844_v50  ;;  %v452_v26 = vrot.slane %v450_v7, 6  ;;  %v857_v28 = vrot.slane %v323_v16, 9  ;;  %v342_v29 = vrot.slane %v340_v13, 4  ;;  %v456_v23 = vshrl.u32 %v323_v16, 16  ;;  %v1018_v4 = vld [vmem:[#allocation6 + $0x48] sm:$0xff]  }
  0x63   :  { %925 = vmatmul.mubr.msk.bf16.vlgmr.msra.gmra.mrb[0].mxu0 %vm189_vm5, %v845_v55  ;;  %v459_v30 = vshll.u32 %v323_v16, 16  ;;  %v445_v33 = vrot.slane %v443_v21, 4  ;;  %v465_v15 = vrot.slane %v152_v24, 6  ;;  %v464_v39 = vrot.slane %v156_v25, 5  ;;  %v1024_v16 = vld [vmem:[#allocation9 + $0x28] sm:$0xff]  }
  0x64   :  { %929 = vmatpush3.bf16.msra.mxu0 %v1253_v10  ;;  %932 = vmatprep.mubr.msk.bf16.mxu0 %vm189_vm5, %v850_v54  ;;  %v435_v10 = vrot.slane %v433_v0, 5  ;;  %v453_v34 = vor.u32 %v452_v26, %v449_v22  ;;  %v341_v37 = vsel %vm1302_vm8, %v857_v28, %v340_v13  ;;  %v344_v38 = vsel %vm1302_vm8, %v342_v29, %v343_v27  ;;  %v1022_v13 = vld [vmem:[#allocation9 + $0x18] sm:$0xff]  }
  0x65   :  { %930 = vmatprep.subr.bf16.mxu0 %v1011_v56  ;;  %v458_v40 = vrot.slane %v456_v23, 5  ;;  %v461_v41 = vrot.slane %v459_v30, 6  ;;  %v470_v42 = vshrl.u32 %v428_v35, 16  ;;  %v473_v43 = vshll.u32 %v428_v35, 16  ;;  %v666_v26 = vld [vmem:[#allocation8 + $0x8] sm:$0xff] }
  0x66   :  { %v439_v20 = vor.u32 %v438_v11, %v435_v10  ;;  %v454_v24 = vsel %vm1319_vm11, %v445_v33, %v453_v34  ;;  %v859_v45 = vcombine.low %v341_v37, %v344_v38  ;;  %v466_v46 = vor.u32 %v465_v15, %v464_v39 }
  0x67   :  { %v462_v48 = vor.u32 %v461_v41, %v458_v40  ;;  %v472_v49 = vrot.slane %v470_v42, 5  ;;  %v475_v50 = vrot.slane %v473_v43, 6  ;;  %v571_v25 = vrot.slane %v1261_v17, 6 }
  0x68   :  { %931 = vmatpush3.bf16.msra.mxu0 %v1011_v56  ;;  %v440_v32 = vrot.slane %v439_v20, 4  ;;  %v468_v54 = vrot.slane %v466_v46, 4  ;;  %v1017_v56 = vld [vmem:[#allocation6 + $0x40] sm:$0xff]   ;;  %v870_v57 = vrot.slane %v560_v52, 10  ;;  %v574_v59 = vrot.slane %v1300_v61, 6  ;;  %v1026_v20 = vld [vmem:[#allocation9 + $0x38] sm:$0xff]  }
  0x69   :  { %936 = vmatprep.subr.bf16.mxu0 %v1012_v60  ;;  %v463_v53 = vrot.slane %v462_v48, 4  ;;  %v476_v55 = vor.u32 %v475_v50, %v472_v49  ;;  %v573_v58 = vrot.slane %v571_v25, 4  ;;  %v578_v3 = vrot.slane %v1263_v18, 6  ;;  %v1020_v18 = vld [vmem:[#allocation9 + $0x8] sm:$0xff]  }
  0x6a   :  { %v444_v44 = vsel %vm1319_vm11, %v440_v32, %v443_v21  ;;  %v572_v63 = vsel %vm1340_vm14, %v870_v57, %v571_v25  ;;  %v871_v6 = vrot.slane %v561_v5, 10  ;;  %v581_v8 = vrot.slane %v428_v35, 6  ;;  %963 = vmatpush3.bf16.msra.mxu1 %v1020_v18  ;;  %v665_v21 = vld [vmem:[#allocation8] sm:$0xff] }
  0x6b   :  { %v864_v47 = vcombine.low %v444_v44, %v454_v24  ;;  %v477_v62 = vsel %vm1319_vm11, %v468_v54, %v476_v55  ;;  %v575_v0 = vsel %vm1340_vm14, %v573_v58, %v574_v59  ;;  %v580_v7 = vrot.slane %v578_v3, 4  ;;  %964 = vmatprep.subr.bf16.mxu1 %v1158_v1 }
  0x6c   :  { %v872_v2 = vcombine.low %v572_v63, %v575_v0  ;;  %v579_v9 = vsel %vm1340_vm14, %v871_v6, %v578_v3 }
  0x6d   :  { %v582_v10 = vsel %vm1340_vm14, %v580_v7, %v581_v8 }
  0x6e   :  { %v873_v11 = vcombine.low %v579_v9, %v582_v10 }
  0x6f   :  { %933 = vmatmul.mubr.msk.bf16.vlgmr.msra.gmra.mrb[0].mxu0 %vm189_vm5, %v851_v12  ;;  %v1021_v12 = vld [vmem:[#allocation9 + $0x10] sm:$0xff]  }
  0x70   :  { %937 = vmatpush3.bf16.msra.mxu0 %v1012_v60  ;;  %940 = vmatprep.mubr.msk.bf16.mxu0 %vm189_vm5, %v858_v14  ;;  %v467_v60 = vsel %vm1319_vm11, %v463_v53, %v466_v46  ;;  %v1023_v14 = vld [vmem:[#allocation9 + $0x20] sm:$0xff]   ;;  %v878_v53 = vld [vmem:[%s1388_s4] ss:$0 sm:$0xff]  ;;  %s829_s4 = sshll.u32 %s1160_s29, 4  ;;  %s830_s4 = int_to_ptr.vmem [resolvable:$true] %s829_s4 }
  0x71   :  { %938 = vmatprep.subr.bf16.mxu0 %v1014_v19  ;;  %v865_v61 = vcombine.low %v467_v60, %v477_v62  ;;  %965 = vmatpush3.bf16.msra.mxu1 %v1021_v12  ;;  %s1119_s17 = scalar_lea.vmem %s830_s4, 32  ;;  %p1124_p5 = scmp.lt.s32.totalorder %s830_s4, %s830_s4 }
  0x72   :  { %966 = vmatprep.subr.bf16.mxu1 %v1158_v1  ;;  %p1120_p4 = scmp.ne.s32.totalorder %s830_s4, %s1119_s17  ;;  %p1125_p6 = scmp.lt.s32.totalorder %s1119_s17, %s1119_s17 }
  0x74   :  { %939 = vmatpush3.bf16.msra.mxu0 %v1014_v19  ;;  %v1025_v19 = vld [vmem:[#allocation9 + $0x30] sm:$0xff]   ;;  %p1126_p7 = por %p1125_p6, %p1124_p5 }
  0x75   :  { %944 = vmatprep.subr.bf16.mxu0 %v1015_v31  ;;  %967 = vmatpush3.bf16.msra.mxu1 %v1022_v13 }
  0x76   :  { %968 = vmatprep.subr.bf16.mxu1 %v1158_v1  ;;  %p1127_p8 = pnand %p1126_p7, %p1120_p4 }
  0x79   :  { %969 = vmatpush3.bf16.msra.mxu1 %v1023_v14 }
  0x7a   :  { %970 = vmatprep.subr.bf16.mxu1 %v1158_v1 }
  0x7b   :  { %941 = vmatmul.mubr.msk.bf16.vlgmr.msra.gmra.mrb[0].mxu0 %vm189_vm5, %v859_v45 }
  0x7c   :  { %945 = vmatpush3.bf16.msra.mxu0 %v1015_v31  ;;  %948 = vmatprep.mubr.msk.bf16.mxu0 %vm189_vm5, %v864_v47 }
  0x7d   :  { %946 = vmatprep.subr.bf16.mxu0 %v1016_v51  ;;  %971 = vmatpush3.bf16.msra.mxu1 %v1024_v16 }
  0x7e   :  { %972 = vmatprep.subr.bf16.mxu1 %v1158_v1 }
  0x80   :  { %947 = vmatpush3.bf16.msra.mxu0 %v1016_v51 }
  0x81   :  { %952 = vmatprep.subr.bf16.mxu0 %v1017_v56  ;;  %973 = vmatpush3.bf16.msra.mxu1 %v1025_v19 }
  0x82   :  { %974 = vmatprep.subr.bf16.mxu1 %v1158_v1 }
  0x85   :  { %975 = vmatpush3.bf16.msra.mxu1 %v1026_v20 }
  0x87   :  { %949 = vmatmul.mubr.msk.bf16.vlgmr.msra.gmra.mrb[0].mxu0 %vm189_vm5, %v865_v61 }
  0x88   :  { %953 = vmatpush3.bf16.msra.mxu0 %v1017_v56  ;;  %956 = vmatprep.mubr.msk.bf16.mxu0 %vm189_vm5, %v872_v2 }
  0x89   :  { %954 = vmatprep.subr.bf16.mxu0 %v1018_v4 }
  0x8c   :  { %955 = vmatpush3.bf16.msra.mxu0 %v1018_v4 }
  0x93   :  { %957 = vmatmul.mubr.msk.bf16.vlgmr.msra.gmra.mrb[0].mxu0 %vm189_vm5, %v873_v11 }
 0x166   :  { %v958_v22 = vpop.f32.mrb[0].mxu0 }
 0x167   :  { %v669_v27 = vadd.f32 %v958_v22, %v665_v21  ;;  %v646_v28 = vpop.f32.mrb[1].mxu0 }
 0x168   :  { %v667_v29 = vadd.f32 %v665_v21, %v646_v28  ;;  %v959_v23 = vpop.f32.mrb[2].mxu0 }
 0x169   :  { %v670_v30 = vadd.f32 %v959_v23, %v666_v26  ;;  %v649_v31 = vpop.f32.mrb[3].mxu0  ;;  %v673_v33 = vmax.f32 %v669_v27, 0.0 }
 0x16a   :  { %v668_v32 = vadd.f32 %v666_v26, %v649_v31  ;;  %v671_v35 = vmax.f32 %v667_v29, 0.0 }
 0x16b   :  { %v674_v34 = vmax.f32 %v670_v30, 0.0 }
 0x16c   :  { %v672_v36 = vmax.f32 %v668_v32, 0.0 }
 0x16d   :  { %v682_v15 = vmax.f32 %v673_v33, %v674_v34 }
 0x16e   :  { %v675_v37 = vmax.f32 %v671_v35, %v672_v36 }
 0x16f   :  { %v683_v38 = vrot.slane %v682_v15, 4 }
 0x170   :  { %v676_v39 = vrot.slane %v675_v37, 4 }
 0x171   :  { %v684_v1 = vmax.f32 %v682_v15, %v683_v38 }
 0x172   :  { %v677_v40 = vmax.f32 %v675_v37, %v676_v39 }
 0x173   :  { %v685_v41 = vrot.slane %v684_v1, 2 }
 0x174   :  { %v678_v42 = vrot.slane %v677_v40, 2 }
 0x175   :  { %v686_v43 = vmax.f32 %v684_v1, %v685_v41 }
 0x176   :  { %v679_v44 = vmax.f32 %v677_v40, %v678_v42 }
 0x177   :  { %v687_v24 = vrot.slane %v686_v43, 1 }
 0x178   :  { %v680_v45 = vrot.slane %v679_v44, 1 }
 0x179   :  { %v688_v46 = vmax.f32 %v686_v43, %v687_v24 }
 0x17a   :  { %v681_v47 = vmax.f32 %v679_v44, %v680_v45 }
 0x17b   :  { %v690_v48 = vpack.c.bf16 %v688_v46, %v688_v46 }
 0x17c   :  { %v689_v49 = vpack.c.bf16 %v681_v47, %v681_v47 }
 0x17d   :  { %v717_v50 = vunpack.c.l.b16 %v690_v48 }
 0x17e   :  { %v716_v51 = vunpack.c.l.b16 %v689_v49 }
 0x180   :  { %v719_v25 = vsel %vm718_vm0, %v717_v50, %v716_v51 }
 0x181   :  { %v720_v52 = vpack.c.b16 %v719_v25, %v719_v25 }
 0x183   :  { %977 = vmatmul.mubr.bf16.vlgmr.msra.gmra.mrb[0].mxu1 %v720_v52 }
 0x256   :  { %v804_v54 = vpop.f32.mrb[0].mxu1 }
 0x257   :  { %v805_v55 = vadd.f32 %v878_v53, %v804_v54  ;;  %v978_v56 = vpop.f32.mrb[1].mxu1 }
 0x258   :  { %v807_v57 = vpop.f32.mrb[2].mxu1 }
 0x259   :  { %v979_v58 = vpop.f32.mrb[3].mxu1  ;;  %v811_v59 = vsel %vm566_vm12, %v805_v55, -inf }
 0x25a   :  { %812 = vmax.xlane.f32.xlu0 %v811_v59 }
 0x2e7   :  { %v813_v17 = vpop.xlane.xlu0 %812 }
 0x2e8   :  { %v814_v60 = vsub.f32 %v805_v55, %v813_v17 }
 0x2ea   :  { %v815_v62 = vmul.f32 1.442695, %v814_v60 }
 0x2ec   :  { %1027 = vpow2.f32 %v815_v62 }
 0x2f6   :  { %v1028_v63 = vpop.eup %1027 }
 0x2f7   :  { %v817_v0 = vsel %vm566_vm12, %v1028_v63, 0.0 }
 0x2f8   :  { %818 = vadd.xlane.f32.xlu0 %v817_v0 }
 0x385   :  { %v819_v61 = vpop.xlane.xlu0 %818 }
 0x386   :  { %1029 = vrcp.f32 %v819_v61 }
 0x390   :  { %v1030_v2 = vpop.eup %1029 }
 0x391   :  { %v821_v3 = vmul.f32 %v1030_v2, %v1028_v63 }
 0x393   :  { %822 = vst [vmem:[#allocation11] sm:$0x3] %v821_v3 }
 0x394   :  { %1130 = shalt.err (!%p1127_p8)
}
 0x395   :  { %s1131_s21 = scalar_lea.hbm %s1389_s5, 32 }
 0x396   :  { %p1132_p9 = scmp.ne.s32.totalorder %s1389_s5, %s1131_s21  ;;  %p1135_p10 = scmp.lt.u32.totalorder %s1131_s21, %s1389_s5 }
 0x398   :  { %p1137_p11 = pnand %p1135_p10, %p1132_p9 }
 0x39a   :  { %1140 = shalt.err (!%p1137_p11)
}
 0x39b   :  { %832 = dma.vmem_to_hbm [thread:$0]  %s830_s4, 32, %s1389_s5, [#allocation5]  }
 0x39c   :  { %1147 = dma.done.wait [#allocation5], 32  }
 0x39d   :  { %1148 = vsyncadd [#allocation5], 4294967264 }
 0x39e   :  { %836 = vsyncpa [#allocation4], 1 }
 0x39f   :  { %837 = vsyncpa [#allocation7], 1 }
 0x3a0   :  { %838 = vsyncpa [#allocation10], 1 }
 0x3a1   :  { %839 = vsyncpa [#allocation5], 1 }

</bundles_post_ra>
